<compile_context>
chip_gen: v7x
topology: tpu7x:2x2x1
jax: 0.10.0
libtpu: 0.0.40
codegen_flags: <defaults>
</compile_context>

<pallas_src>
import functools

import numpy as np
import jax
import jax.numpy as jnp
from jax import lax
from jax.experimental import pallas as pl
from jax.experimental.pallas import tpu as pltpu


def _round_up(x, m):
    return ((x + m - 1) // m) * m


def _decoder_block_kernel(x_ref, nl_ref, nr_ref,
                          wid_ref, bid_ref,
                          w1_ref, b1_ref,
                          w2_ref, b2_ref,
                          w3_ref, b3_ref,
                          w4_ref, b4_ref,
                          o_ref,
                          shift_ref,
                          *, H, W, post_gain, pad):
    HW = H * W

    # Zero the staging buffer: its left/right halo lanes provide the conv's
    # zero padding in the H direction; the centre is overwritten before use.
    # (Done every grid step so each core's scratch is valid under "parallel".)
    shift_ref[...] = jnp.zeros_like(shift_ref)

    x = x_ref[0].astype(jnp.float32)          # (C_in, H*W), lane-dense spatial

    # Hoisted W-edge masks (1, H*W), shared by all three 3x3 convs.
    not_left = nl_ref[...]                    # 0 where w == 0
    not_right = nr_ref[...]                   # 0 where w == W-1

    def conv3x3(a, w_ref, b_ref):
        # a: (n_hid, H*W) f32.  Stage into the zero-haloed buffer with one
        # lane-aligned store, then read the 9 taps as shifted lane windows.
        shift_ref[:, pad:pad + HW] = a
        acc = None
        k = 0
        for dh in (-1, 0, 1):
            for dw in (-1, 0, 1):
                tap = shift_ref[:, pl.ds(pad + dh * W + dw, HW)]
                if dw == -1:
                    tap = tap * not_left      # zero wrapped column w-1
                elif dw == 1:
                    tap = tap * not_right     # zero wrapped column w+1
                part = jnp.dot(w_ref[k], tap,
                               preferred_element_type=jnp.float32)
                acc = part if acc is None else acc + part
                k += 1
        return acc + b_ref[...]

    # Identity path: 1x1 conv + bias (wrapper passes eye/zeros for nn.Identity).
    idp = jnp.dot(wid_ref[...], x, preferred_element_type=jnp.float32) + bid_ref[...]

    # Residual path: ReLU -> 1x1 -> ReLU -> 3x3 -> ReLU -> 3x3 -> ReLU -> 3x3.
    h = jnp.maximum(x, 0.0)
    h = jnp.dot(w1_ref[...], h, preferred_element_type=jnp.float32) + b1_ref[...]
    h = jnp.maximum(h, 0.0)
    h = conv3x3(h, w2_ref, b2_ref)
    h = jnp.maximum(h, 0.0)
    h = conv3x3(h, w3_ref, b3_ref)
    h = jnp.maximum(h, 0.0)
    h = conv3x3(h, w4_ref, b4_ref)

    o_ref[0] = (idp + post_gain * h).astype(o_ref.dtype)


def decoder_block_pallas(x, params, post_gain):
    """DecoderBlock forward.  x: (N, C_in, H, W) NCHW (PyTorch layout)."""
    N, c_in, H, W = x.shape
    HW = H * W
    if HW % 128 != 0:
        # TODO(synk): pad the flattened spatial axis for H*W not a multiple of 128.
        raise ValueError("H*W must be a multiple of 128 for the lane-dense layout")

    n_hid = params["w1"].shape[0]
    n_out = params["w4"].shape[0]
    f32 = jnp.float32

    # --- tiny, one-time weight re-layouts (activations are never transposed) ---
    def conv3_taps(w):  # OIHW (O, I, 3, 3) -> (9, O, I); tap index = kh*3 + kw
        o, i = w.shape[0], w.shape[1]
        return jnp.transpose(w, (2, 3, 0, 1)).reshape(9, o, i).astype(f32)

    w1 = params["w1"][:, :, 0, 0].astype(f32)            # (n_hid, c_in)
    b1 = params["b1"].reshape(n_hid, 1).astype(f32)
    w2 = conv3_taps(params["w2"]); b2 = params["b2"].reshape(n_hid, 1).astype(f32)
    w3 = conv3_taps(params["w3"]); b3 = params["b3"].reshape(n_hid, 1).astype(f32)
    w4 = conv3_taps(params["w4"]); b4 = params["b4"].reshape(n_out, 1).astype(f32)

    if "wid" in params:                                   # id_path is a 1x1 conv
        wid = params["wid"][:, :, 0, 0].astype(f32)       # (n_out, c_in)
        bid = params["bid"].reshape(n_out, 1).astype(f32)
    else:                                                 # id_path is nn.Identity
        wid = jnp.eye(n_out, dtype=f32)
        bid = jnp.zeros((n_out, 1), f32)

    # W-edge masks as constants (avoid in-kernel integer mod on the VPU).
    col = np.arange(HW, dtype=np.int32) % W
    not_left = jnp.asarray((col > 0).astype(np.float32).reshape(1, HW))
    not_right = jnp.asarray((col < (W - 1)).astype(np.float32).reshape(1, HW))

    # Halo (lanes) on each side of the staged activation: covers the largest
    # tap shift (W+1) and keeps the staging store 128-lane aligned.
    pad = _round_up(W + 1, 128)
    buf_lanes = pad + HW + pad

    x_flat = x.reshape(N, c_in, HW)   # free reshape: NCHW is already spatial-minor

    kernel = functools.partial(_decoder_block_kernel, H=H, W=W,
                               post_gain=float(post_gain), pad=pad)

    out_flat = pl.pallas_call(
        kernel,
        out_shape=jax.ShapeDtypeStruct((N, n_out, HW), x.dtype),
        grid_spec=pltpu.PrefetchScalarGridSpec(
            num_scalar_prefetch=0,
            grid=(N,),
            in_specs=[
                pl.BlockSpec((1, c_in, HW), lambda n: (n, 0, 0)),
                pl.BlockSpec((1, HW), lambda n: (0, 0)),
                pl.BlockSpec((1, HW), lambda n: (0, 0)),
                pl.BlockSpec((n_out, c_in), lambda n: (0, 0)),
                pl.BlockSpec((n_out, 1), lambda n: (0, 0)),
                pl.BlockSpec((n_hid, c_in), lambda n: (0, 0)),
                pl.BlockSpec((n_hid, 1), lambda n: (0, 0)),
                pl.BlockSpec((9, n_hid, n_hid), lambda n: (0, 0, 0)),
                pl.BlockSpec((n_hid, 1), lambda n: (0, 0)),
                pl.BlockSpec((9, n_hid, n_hid), lambda n: (0, 0, 0)),
                pl.BlockSpec((n_hid, 1), lambda n: (0, 0)),
                pl.BlockSpec((9, n_out, n_hid), lambda n: (0, 0, 0)),
                pl.BlockSpec((n_out, 1), lambda n: (0, 0)),
            ],
            out_specs=pl.BlockSpec((1, n_out, HW), lambda n: (n, 0, 0)),
            scratch_shapes=[pltpu.VMEM((n_hid, buf_lanes), jnp.float32)],
        ),
        compiler_params=pltpu.CompilerParams(
            dimension_semantics=("parallel",)),
    )(x_flat, not_left, not_right, wid, bid, w1, b1, w2, b2, w3, b3, w4, b4)

    return out_flat.reshape(N, n_out, H, W)   # free reshape back to NCHW


# ----------------------- pure-JAX reference (NCHW) -----------------------
def _conv2d_nchw(x, w, b, padding):
    y = lax.conv_general_dilated(
        x, w, window_strides=(1, 1),
        padding=((padding, padding), (padding, padding)),
        dimension_numbers=("NCHW", "OIHW", "NCHW"))
    return y + b.reshape(1, -1, 1, 1)


def decoder_block_reference(x, params, post_gain):
    idp = _conv2d_nchw(x, params["wid"], params["bid"], 0) if "wid" in params else x
    h = jnp.maximum(x, 0.0)
    h = _conv2d_nchw(h, params["w1"], params["b1"], 0)
    h = jnp.maximum(h, 0.0)
    h = _conv2d_nchw(h, params["w2"], params["b2"], 1)
    h = jnp.maximum(h, 0.0)
    h = _conv2d_nchw(h, params["w3"], params["b3"], 1)
    h = jnp.maximum(h, 0.0)
    h = _conv2d_nchw(h, params["w4"], params["b4"], 1)
    return idp + post_gain * h


if __name__ == "__main__":
    # DecoderBlock(n_in=4, n_out=16, n_layers=2) on a (2, 4, 16, 16) input.
    N, n_in, n_out, H, W = 2, 4, 16, 16, 16
    n_layers = 2
    n_hid = n_out // 4                      # = 4
    post_gain = 1.0 / (n_layers ** 2)

    key = jax.random.PRNGKey(0)
    keys = jax.random.split(key, 6)

    def conv_params(k, out_c, in_c, kw):
        bound = 1.0 / float((in_c * kw * kw) ** 0.5)
        kw_key, kb_key = jax.random.split(k)
        w = jax.random.uniform(kw_key, (out_c, in_c, kw, kw), jnp.float32, -bound, bound)
        b = jax.random.uniform(kb_key, (out_c,), jnp.float32, -bound, bound)
        return w, b

    x = jax.random.normal(keys[0], (N, n_in, H, W), dtype=jnp.float32)

    params = {}
    params["wid"], params["bid"] = conv_params(keys[1], n_out, n_in, 1)   # id_path (n_in != n_out)
    params["w1"], params["b1"] = conv_params(keys[2], n_hid, n_in, 1)
    params["w2"], params["b2"] = conv_params(keys[3], n_hid, n_hid, 3)
    params["w3"], params["b3"] = conv_params(keys[4], n_hid, n_hid, 3)
    params["w4"], params["b4"] = conv_params(keys[5], n_out, n_hid, 3)

    out = decoder_block_pallas(x, params, post_gain)
    out = jax.block_until_ready(out)

    ref = decoder_block_reference(x, params, post_gain)
    assert out.shape == (N, n_out, H, W)
    err = float(jnp.max(jnp.abs(out - ref)))
    assert jnp.allclose(out, ref, atol=1e-4, rtol=1e-4), f"mismatch vs reference, max abs err={err}"

    print("KERNEL_OK")
</pallas_src>

<mosaic_0001>
module attributes {stable_mosaic.version = 11 : i64} {
  func.func @_decoder_block_kernel(%arg0: i32, %arg1: memref<1x4x256xf32, #tpu.memory_space<vmem>>, %arg2: memref<1x256xf32, #tpu.memory_space<vmem>>, %arg3: memref<1x256xf32, #tpu.memory_space<vmem>>, %arg4: memref<16x4xf32, #tpu.memory_space<vmem>>, %arg5: memref<16x1xf32, #tpu.memory_space<vmem>>, %arg6: memref<4x4xf32, #tpu.memory_space<vmem>>, %arg7: memref<4x1xf32, #tpu.memory_space<vmem>>, %arg8: memref<9x4x4xf32, #tpu.memory_space<vmem>>, %arg9: memref<4x1xf32, #tpu.memory_space<vmem>>, %arg10: memref<9x4x4xf32, #tpu.memory_space<vmem>>, %arg11: memref<4x1xf32, #tpu.memory_space<vmem>>, %arg12: memref<9x16x4xf32, #tpu.memory_space<vmem>>, %arg13: memref<16x1xf32, #tpu.memory_space<vmem>>, %arg14: memref<1x16x256xf32, #tpu.memory_space<vmem>>, %arg15: memref<4x512xf32, #tpu.memory_space<vmem>>) attributes {dimension_semantics = [#tpu.dimension_semantics<parallel>], iteration_bounds = array<i64: 2>, scalar_prefetch = 0 : i64, scratch_operands = 1 : i64, tpu.core_type = #tpu.core_type<tc>, window_params = [{transform_indices = @transform_0, window_bounds = array<i64: 1, 4, 256>}, {pipeline_mode = #tpu.pipeline_mode<synchronous>, transform_indices = @transform_1, window_bounds = array<i64: 1, 256>}, {pipeline_mode = #tpu.pipeline_mode<synchronous>, transform_indices = @transform_2, window_bounds = array<i64: 1, 256>}, {pipeline_mode = #tpu.pipeline_mode<synchronous>, transform_indices = @transform_3, window_bounds = array<i64: 16, 4>}, {pipeline_mode = #tpu.pipeline_mode<synchronous>, transform_indices = @transform_4, window_bounds = array<i64: 16, 1>}, {pipeline_mode = #tpu.pipeline_mode<synchronous>, transform_indices = @transform_5, window_bounds = array<i64: 4, 4>}, {pipeline_mode = #tpu.pipeline_mode<synchronous>, transform_indices = @transform_6, window_bounds = array<i64: 4, 1>}, {pipeline_mode = #tpu.pipeline_mode<synchronous>, transform_indices = @transform_7, window_bounds = array<i64: 9, 4, 4>}, {pipeline_mode = #tpu.pipeline_mode<synchronous>, transform_indices = @transform_8, window_bounds = array<i64: 4, 1>}, {pipeline_mode = #tpu.pipeline_mode<synchronous>, transform_indices = @transform_9, window_bounds = array<i64: 9, 4, 4>}, {pipeline_mode = #tpu.pipeline_mode<synchronous>, transform_indices = @transform_10, window_bounds = array<i64: 4, 1>}, {pipeline_mode = #tpu.pipeline_mode<synchronous>, transform_indices = @transform_11, window_bounds = array<i64: 9, 16, 4>}, {pipeline_mode = #tpu.pipeline_mode<synchronous>, transform_indices = @transform_12, window_bounds = array<i64: 16, 1>}, {transform_indices = @transform_13, window_bounds = array<i64: 1, 16, 256>}]} {
    %cst = arith.constant 0.000000e+00 : f32
    %0 = vector.broadcast %cst : f32 to vector<4x512xf32>
    %c0 = arith.constant 0 : index
    %c0_0 = arith.constant 0 : index
    %1 = vector.load %arg15[%c0, %c0_0] : memref<4x512xf32, #tpu.memory_space<vmem>>, vector<4x512xf32>
    tpu.vector_store %arg15[%c0, %c0_0], %0 {strides = array<i32>} : memref<4x512xf32, #tpu.memory_space<vmem>>, vector<4x512xf32>,
    %c0_1 = arith.constant 0 : index
    %c0_2 = arith.constant 0 : index
    %c0_3 = arith.constant 0 : index
    %2 = vector.load %arg1[%c0_1, %c0_2, %c0_3] : memref<1x4x256xf32, #tpu.memory_space<vmem>>, vector<1x4x256xf32>
    %3 = vector.shape_cast %2 : vector<1x4x256xf32> to vector<4x256xf32>
    %c0_4 = arith.constant 0 : index
    %c0_5 = arith.constant 0 : index
    %4 = vector.load %arg2[%c0_4, %c0_5] : memref<1x256xf32, #tpu.memory_space<vmem>>, vector<1x256xf32>
    %c0_6 = arith.constant 0 : index
    %c0_7 = arith.constant 0 : index
    %5 = vector.load %arg3[%c0_6, %c0_7] : memref<1x256xf32, #tpu.memory_space<vmem>>, vector<1x256xf32>
    %c0_8 = arith.constant 0 : index
    %c0_9 = arith.constant 0 : index
    %6 = vector.load %arg4[%c0_8, %c0_9] : memref<16x4xf32, #tpu.memory_space<vmem>>, vector<16x4xf32>
    %cst_10 = arith.constant dense<0.000000e+00> : vector<16x256xf32>
    %7 = tpu.matmul %6, %3, %cst_10 {dimension_numbers = #tpu.dot_dimension_numbers<[1], [0], [0], [1], [0, 0, 1, 1], [], []>} : vector<16x4xf32>, vector<4x256xf32>, vector<16x256xf32> -> vector<16x256xf32>
    %c0_11 = arith.constant 0 : index
    %c0_12 = arith.constant 0 : index
    %8 = vector.load %arg5[%c0_11, %c0_12] : memref<16x1xf32, #tpu.memory_space<vmem>>, vector<16x1xf32>
    %9 = vector.broadcast %8 : vector<16x1xf32> to vector<16x256xf32>
    %10 = arith.addf %7, %9 : vector<16x256xf32>
    %cst_13 = arith.constant 0.000000e+00 : f32
    %11 = vector.broadcast %cst_13 : f32 to vector<4x256xf32>
    %12 = arith.maximumf %3, %11 : vector<4x256xf32>
    %c0_14 = arith.constant 0 : index
    %c0_15 = arith.constant 0 : index
    %13 = vector.load %arg6[%c0_14, %c0_15] : memref<4x4xf32, #tpu.memory_space<vmem>>, vector<4x4xf32>
    %cst_16 = arith.constant dense<0.000000e+00> : vector<4x256xf32>
    %14 = tpu.matmul %13, %12, %cst_16 {dimension_numbers = #tpu.dot_dimension_numbers<[1], [0], [0], [1], [0, 0, 1, 1], [], []>} : vector<4x4xf32>, vector<4x256xf32>, vector<4x256xf32> -> vector<4x256xf32>
    %c0_17 = arith.constant 0 : index
    %c0_18 = arith.constant 0 : index
    %15 = vector.load %arg7[%c0_17, %c0_18] : memref<4x1xf32, #tpu.memory_space<vmem>>, vector<4x1xf32>
    %16 = vector.broadcast %15 : vector<4x1xf32> to vector<4x256xf32>
    %17 = arith.addf %14, %16 : vector<4x256xf32>
    %cst_19 = arith.constant 0.000000e+00 : f32
    %18 = vector.broadcast %cst_19 : f32 to vector<4x256xf32>
    %19 = arith.maximumf %17, %18 : vector<4x256xf32>
    %c0_20 = arith.constant 0 : index
    %c128 = arith.constant 128 : index
    %20 = vector.load %arg15[%c0_20, %c128] : memref<4x512xf32, #tpu.memory_space<vmem>>, vector<4x256xf32>
    tpu.vector_store %arg15[%c0_20, %c128], %19 {strides = array<i32>} : memref<4x512xf32, #tpu.memory_space<vmem>>, vector<4x256xf32>,
    %c0_21 = arith.constant 0 : index
    %c111 = arith.constant 111 : index
    %21 = vector.load %arg15[%c0_21, %c111] : memref<4x512xf32, #tpu.memory_space<vmem>>, vector<4x256xf32>
    %22 = vector.broadcast %4 : vector<1x256xf32> to vector<4x256xf32>
    %23 = arith.mulf %21, %22 : vector<4x256xf32>
    %c0_22 = arith.constant 0 : index
    %c0_23 = arith.constant 0 : index
    %c0_24 = arith.constant 0 : index
    %24 = vector.load %arg8[%c0_22, %c0_23, %c0_24] : memref<9x4x4xf32, #tpu.memory_space<vmem>>, vector<1x4x4xf32>
    %25 = vector.shape_cast %24 : vector<1x4x4xf32> to vector<4x4xf32>
    %cst_25 = arith.constant dense<0.000000e+00> : vector<4x256xf32>
    %26 = tpu.matmul %25, %23, %cst_25 {dimension_numbers = #tpu.dot_dimension_numbers<[1], [0], [0], [1], [0, 0, 1, 1], [], []>} : vector<4x4xf32>, vector<4x256xf32>, vector<4x256xf32> -> vector<4x256xf32>
    %c0_26 = arith.constant 0 : index
    %c112 = arith.constant 112 : index
    %27 = vector.load %arg15[%c0_26, %c112] : memref<4x512xf32, #tpu.memory_space<vmem>>, vector<4x256xf32>
    %c1 = arith.constant 1 : index
    %c0_27 = arith.constant 0 : index
    %c0_28 = arith.constant 0 : index
    %28 = vector.load %arg8[%c1, %c0_27, %c0_28] : memref<9x4x4xf32, #tpu.memory_space<vmem>>, vector<1x4x4xf32>
    %29 = vector.shape_cast %28 : vector<1x4x4xf32> to vector<4x4xf32>
    %cst_29 = arith.constant dense<0.000000e+00> : vector<4x256xf32>
    %30 = tpu.matmul %29, %27, %cst_29 {dimension_numbers = #tpu.dot_dimension_numbers<[1], [0], [0], [1], [0, 0, 1, 1], [], []>} : vector<4x4xf32>, vector<4x256xf32>, vector<4x256xf32> -> vector<4x256xf32>
    %31 = arith.addf %26, %30 : vector<4x256xf32>
    %c0_30 = arith.constant 0 : index
    %c113 = arith.constant 113 : index
    %32 = vector.load %arg15[%c0_30, %c113] : memref<4x512xf32, #tpu.memory_space<vmem>>, vector<4x256xf32>
    %33 = vector.broadcast %5 : vector<1x256xf32> to vector<4x256xf32>
    %34 = arith.mulf %32, %33 : vector<4x256xf32>
    %c2 = arith.constant 2 : index
    %c0_31 = arith.constant 0 : index
    %c0_32 = arith.constant 0 : index
    %35 = vector.load %arg8[%c2, %c0_31, %c0_32] : memref<9x4x4xf32, #tpu.memory_space<vmem>>, vector<1x4x4xf32>
    %36 = vector.shape_cast %35 : vector<1x4x4xf32> to vector<4x4xf32>
    %cst_33 = arith.constant dense<0.000000e+00> : vector<4x256xf32>
    %37 = tpu.matmul %36, %34, %cst_33 {dimension_numbers = #tpu.dot_dimension_numbers<[1], [0], [0], [1], [0, 0, 1, 1], [], []>} : vector<4x4xf32>, vector<4x256xf32>, vector<4x256xf32> -> vector<4x256xf32>
    %38 = arith.addf %31, %37 : vector<4x256xf32>
    %c0_34 = arith.constant 0 : index
    %c127 = arith.constant 127 : index
    %39 = vector.load %arg15[%c0_34, %c127] : memref<4x512xf32, #tpu.memory_space<vmem>>, vector<4x256xf32>
    %40 = vector.broadcast %4 : vector<1x256xf32> to vector<4x256xf32>
    %41 = arith.mulf %39, %40 : vector<4x256xf32>
    %c3 = arith.constant 3 : index
    %c0_35 = arith.constant 0 : index
    %c0_36 = arith.constant 0 : index
    %42 = vector.load %arg8[%c3, %c0_35, %c0_36] : memref<9x4x4xf32, #tpu.memory_space<vmem>>, vector<1x4x4xf32>
    %43 = vector.shape_cast %42 : vector<1x4x4xf32> to vector<4x4xf32>
    %cst_37 = arith.constant dense<0.000000e+00> : vector<4x256xf32>
    %44 = tpu.matmul %43, %41, %cst_37 {dimension_numbers = #tpu.dot_dimension_numbers<[1], [0], [0], [1], [0, 0, 1, 1], [], []>} : vector<4x4xf32>, vector<4x256xf32>, vector<4x256xf32> -> vector<4x256xf32>
    %45 = arith.addf %38, %44 : vector<4x256xf32>
    %c0_38 = arith.constant 0 : index
    %c128_39 = arith.constant 128 : index
    %46 = vector.load %arg15[%c0_38, %c128_39] : memref<4x512xf32, #tpu.memory_space<vmem>>, vector<4x256xf32>
    %c4 = arith.constant 4 : index
    %c0_40 = arith.constant 0 : index
    %c0_41 = arith.constant 0 : index
    %47 = vector.load %arg8[%c4, %c0_40, %c0_41] : memref<9x4x4xf32, #tpu.memory_space<vmem>>, vector<1x4x4xf32>
    %48 = vector.shape_cast %47 : vector<1x4x4xf32> to vector<4x4xf32>
    %cst_42 = arith.constant dense<0.000000e+00> : vector<4x256xf32>
    %49 = tpu.matmul %48, %46, %cst_42 {dimension_numbers = #tpu.dot_dimension_numbers<[1], [0], [0], [1], [0, 0, 1, 1], [], []>} : vector<4x4xf32>, vector<4x256xf32>, vector<4x256xf32> -> vector<4x256xf32>
    %50 = arith.addf %45, %49 : vector<4x256xf32>
    %c0_43 = arith.constant 0 : index
    %c129 = arith.constant 129 : index
    %51 = vector.load %arg15[%c0_43, %c129] : memref<4x512xf32, #tpu.memory_space<vmem>>, vector<4x256xf32>
    %52 = vector.broadcast %5 : vector<1x256xf32> to vector<4x256xf32>
    %53 = arith.mulf %51, %52 : vector<4x256xf32>
    %c5 = arith.constant 5 : index
    %c0_44 = arith.constant 0 : index
    %c0_45 = arith.constant 0 : index
    %54 = vector.load %arg8[%c5, %c0_44, %c0_45] : memref<9x4x4xf32, #tpu.memory_space<vmem>>, vector<1x4x4xf32>
    %55 = vector.shape_cast %54 : vector<1x4x4xf32> to vector<4x4xf32>
    %cst_46 = arith.constant dense<0.000000e+00> : vector<4x256xf32>
    %56 = tpu.matmul %55, %53, %cst_46 {dimension_numbers = #tpu.dot_dimension_numbers<[1], [0], [0], [1], [0, 0, 1, 1], [], []>} : vector<4x4xf32>, vector<4x256xf32>, vector<4x256xf32> -> vector<4x256xf32>
    %57 = arith.addf %50, %56 : vector<4x256xf32>
    %c0_47 = arith.constant 0 : index
    %c143 = arith.constant 143 : index
    %58 = vector.load %arg15[%c0_47, %c143] : memref<4x512xf32, #tpu.memory_space<vmem>>, vector<4x256xf32>
    %59 = vector.broadcast %4 : vector<1x256xf32> to vector<4x256xf32>
    %60 = arith.mulf %58, %59 : vector<4x256xf32>
    %c6 = arith.constant 6 : index
    %c0_48 = arith.constant 0 : index
    %c0_49 = arith.constant 0 : index
    %61 = vector.load %arg8[%c6, %c0_48, %c0_49] : memref<9x4x4xf32, #tpu.memory_space<vmem>>, vector<1x4x4xf32>
    %62 = vector.shape_cast %61 : vector<1x4x4xf32> to vector<4x4xf32>
    %cst_50 = arith.constant dense<0.000000e+00> : vector<4x256xf32>
    %63 = tpu.matmul %62, %60, %cst_50 {dimension_numbers = #tpu.dot_dimension_numbers<[1], [0], [0], [1], [0, 0, 1, 1], [], []>} : vector<4x4xf32>, vector<4x256xf32>, vector<4x256xf32> -> vector<4x256xf32>
    %64 = arith.addf %57, %63 : vector<4x256xf32>
    %c0_51 = arith.constant 0 : index
    %c144 = arith.constant 144 : index
    %65 = vector.load %arg15[%c0_51, %c144] : memref<4x512xf32, #tpu.memory_space<vmem>>, vector<4x256xf32>
    %c7 = arith.constant 7 : index
    %c0_52 = arith.constant 0 : index
    %c0_53 = arith.constant 0 : index
    %66 = vector.load %arg8[%c7, %c0_52, %c0_53] : memref<9x4x4xf32, #tpu.memory_space<vmem>>, vector<1x4x4xf32>
    %67 = vector.shape_cast %66 : vector<1x4x4xf32> to vector<4x4xf32>
    %cst_54 = arith.constant dense<0.000000e+00> : vector<4x256xf32>
    %68 = tpu.matmul %67, %65, %cst_54 {dimension_numbers = #tpu.dot_dimension_numbers<[1], [0], [0], [1], [0, 0, 1, 1], [], []>} : vector<4x4xf32>, vector<4x256xf32>, vector<4x256xf32> -> vector<4x256xf32>
    %69 = arith.addf %64, %68 : vector<4x256xf32>
    %c0_55 = arith.constant 0 : index
    %c145 = arith.constant 145 : index
    %70 = vector.load %arg15[%c0_55, %c145] : memref<4x512xf32, #tpu.memory_space<vmem>>, vector<4x256xf32>
    %71 = vector.broadcast %5 : vector<1x256xf32> to vector<4x256xf32>
    %72 = arith.mulf %70, %71 : vector<4x256xf32>
    %c8 = arith.constant 8 : index
    %c0_56 = arith.constant 0 : index
    %c0_57 = arith.constant 0 : index
    %73 = vector.load %arg8[%c8, %c0_56, %c0_57] : memref<9x4x4xf32, #tpu.memory_space<vmem>>, vector<1x4x4xf32>
    %74 = vector.shape_cast %73 : vector<1x4x4xf32> to vector<4x4xf32>
    %cst_58 = arith.constant dense<0.000000e+00> : vector<4x256xf32>
    %75 = tpu.matmul %74, %72, %cst_58 {dimension_numbers = #tpu.dot_dimension_numbers<[1], [0], [0], [1], [0, 0, 1, 1], [], []>} : vector<4x4xf32>, vector<4x256xf32>, vector<4x256xf32> -> vector<4x256xf32>
    %76 = arith.addf %69, %75 : vector<4x256xf32>
    %c0_59 = arith.constant 0 : index
    %c0_60 = arith.constant 0 : index
    %77 = vector.load %arg9[%c0_59, %c0_60] : memref<4x1xf32, #tpu.memory_space<vmem>>, vector<4x1xf32>
    %78 = vector.broadcast %77 : vector<4x1xf32> to vector<4x256xf32>
    %79 = arith.addf %76, %78 : vector<4x256xf32>
    %cst_61 = arith.constant 0.000000e+00 : f32
    %80 = vector.broadcast %cst_61 : f32 to vector<4x256xf32>
    %81 = arith.maximumf %79, %80 : vector<4x256xf32>
    %c0_62 = arith.constant 0 : index
    %c128_63 = arith.constant 128 : index
    %82 = vector.load %arg15[%c0_62, %c128_63] : memref<4x512xf32, #tpu.memory_space<vmem>>, vector<4x256xf32>
    tpu.vector_store %arg15[%c0_62, %c128_63], %81 {strides = array<i32>} : memref<4x512xf32, #tpu.memory_space<vmem>>, vector<4x256xf32>,
    %c0_64 = arith.constant 0 : index
    %c111_65 = arith.constant 111 : index
    %83 = vector.load %arg15[%c0_64, %c111_65] : memref<4x512xf32, #tpu.memory_space<vmem>>, vector<4x256xf32>
    %84 = vector.broadcast %4 : vector<1x256xf32> to vector<4x256xf32>
    %85 = arith.mulf %83, %84 : vector<4x256xf32>
    %c0_66 = arith.constant 0 : index
    %c0_67 = arith.constant 0 : index
    %c0_68 = arith.constant 0 : index
    %86 = vector.load %arg10[%c0_66, %c0_67, %c0_68] : memref<9x4x4xf32, #tpu.memory_space<vmem>>, vector<1x4x4xf32>
    %87 = vector.shape_cast %86 : vector<1x4x4xf32> to vector<4x4xf32>
    %cst_69 = arith.constant dense<0.000000e+00> : vector<4x256xf32>
    %88 = tpu.matmul %87, %85, %cst_69 {dimension_numbers = #tpu.dot_dimension_numbers<[1], [0], [0], [1], [0, 0, 1, 1], [], []>} : vector<4x4xf32>, vector<4x256xf32>, vector<4x256xf32> -> vector<4x256xf32>
    %c0_70 = arith.constant 0 : index
    %c112_71 = arith.constant 112 : index
    %89 = vector.load %arg15[%c0_70, %c112_71] : memref<4x512xf32, #tpu.memory_space<vmem>>, vector<4x256xf32>
    %c1_72 = arith.constant 1 : index
    %c0_73 = arith.constant 0 : index
    %c0_74 = arith.constant 0 : index
    %90 = vector.load %arg10[%c1_72, %c0_73, %c0_74] : memref<9x4x4xf32, #tpu.memory_space<vmem>>, vector<1x4x4xf32>
    %91 = vector.shape_cast %90 : vector<1x4x4xf32> to vector<4x4xf32>
    %cst_75 = arith.constant dense<0.000000e+00> : vector<4x256xf32>
    %92 = tpu.matmul %91, %89, %cst_75 {dimension_numbers = #tpu.dot_dimension_numbers<[1], [0], [0], [1], [0, 0, 1, 1], [], []>} : vector<4x4xf32>, vector<4x256xf32>, vector<4x256xf32> -> vector<4x256xf32>
    %93 = arith.addf %88, %92 : vector<4x256xf32>
    %c0_76 = arith.constant 0 : index
    %c113_77 = arith.constant 113 : index
    %94 = vector.load %arg15[%c0_76, %c113_77] : memref<4x512xf32, #tpu.memory_space<vmem>>, vector<4x256xf32>
    %95 = vector.broadcast %5 : vector<1x256xf32> to vector<4x256xf32>
    %96 = arith.mulf %94, %95 : vector<4x256xf32>
    %c2_78 = arith.constant 2 : index
    %c0_79 = arith.constant 0 : index
    %c0_80 = arith.constant 0 : index
    %97 = vector.load %arg10[%c2_78, %c0_79, %c0_80] : memref<9x4x4xf32, #tpu.memory_space<vmem>>, vector<1x4x4xf32>
    %98 = vector.shape_cast %97 : vector<1x4x4xf32> to vector<4x4xf32>
    %cst_81 = arith.constant dense<0.000000e+00> : vector<4x256xf32>
    %99 = tpu.matmul %98, %96, %cst_81 {dimension_numbers = #tpu.dot_dimension_numbers<[1], [0], [0], [1], [0, 0, 1, 1], [], []>} : vector<4x4xf32>, vector<4x256xf32>, vector<4x256xf32> -> vector<4x256xf32>
    %100 = arith.addf %93, %99 : vector<4x256xf32>
    %c0_82 = arith.constant 0 : index
    %c127_83 = arith.constant 127 : index
    %101 = vector.load %arg15[%c0_82, %c127_83] : memref<4x512xf32, #tpu.memory_space<vmem>>, vector<4x256xf32>
    %102 = vector.broadcast %4 : vector<1x256xf32> to vector<4x256xf32>
    %103 = arith.mulf %101, %102 : vector<4x256xf32>
    %c3_84 = arith.constant 3 : index
    %c0_85 = arith.constant 0 : index
    %c0_86 = arith.constant 0 : index
    %104 = vector.load %arg10[%c3_84, %c0_85, %c0_86] : memref<9x4x4xf32, #tpu.memory_space<vmem>>, vector<1x4x4xf32>
    %105 = vector.shape_cast %104 : vector<1x4x4xf32> to vector<4x4xf32>
    %cst_87 = arith.constant dense<0.000000e+00> : vector<4x256xf32>
    %106 = tpu.matmul %105, %103, %cst_87 {dimension_numbers = #tpu.dot_dimension_numbers<[1], [0], [0], [1], [0, 0, 1, 1], [], []>} : vector<4x4xf32>, vector<4x256xf32>, vector<4x256xf32> -> vector<4x256xf32>
    %107 = arith.addf %100, %106 : vector<4x256xf32>
    %c0_88 = arith.constant 0 : index
    %c128_89 = arith.constant 128 : index
    %108 = vector.load %arg15[%c0_88, %c128_89] : memref<4x512xf32, #tpu.memory_space<vmem>>, vector<4x256xf32>
    %c4_90 = arith.constant 4 : index
    %c0_91 = arith.constant 0 : index
    %c0_92 = arith.constant 0 : index
    %109 = vector.load %arg10[%c4_90, %c0_91, %c0_92] : memref<9x4x4xf32, #tpu.memory_space<vmem>>, vector<1x4x4xf32>
    %110 = vector.shape_cast %109 : vector<1x4x4xf32> to vector<4x4xf32>
    %cst_93 = arith.constant dense<0.000000e+00> : vector<4x256xf32>
    %111 = tpu.matmul %110, %108, %cst_93 {dimension_numbers = #tpu.dot_dimension_numbers<[1], [0], [0], [1], [0, 0, 1, 1], [], []>} : vector<4x4xf32>, vector<4x256xf32>, vector<4x256xf32> -> vector<4x256xf32>
    %112 = arith.addf %107, %111 : vector<4x256xf32>
    %c0_94 = arith.constant 0 : index
    %c129_95 = arith.constant 129 : index
    %113 = vector.load %arg15[%c0_94, %c129_95] : memref<4x512xf32, #tpu.memory_space<vmem>>, vector<4x256xf32>
    %114 = vector.broadcast %5 : vector<1x256xf32> to vector<4x256xf32>
    %115 = arith.mulf %113, %114 : vector<4x256xf32>
    %c5_96 = arith.constant 5 : index
    %c0_97 = arith.constant 0 : index
    %c0_98 = arith.constant 0 : index
    %116 = vector.load %arg10[%c5_96, %c0_97, %c0_98] : memref<9x4x4xf32, #tpu.memory_space<vmem>>, vector<1x4x4xf32>
    %117 = vector.shape_cast %116 : vector<1x4x4xf32> to vector<4x4xf32>
    %cst_99 = arith.constant dense<0.000000e+00> : vector<4x256xf32>
    %118 = tpu.matmul %117, %115, %cst_99 {dimension_numbers = #tpu.dot_dimension_numbers<[1], [0], [0], [1], [0, 0, 1, 1], [], []>} : vector<4x4xf32>, vector<4x256xf32>, vector<4x256xf32> -> vector<4x256xf32>
    %119 = arith.addf %112, %118 : vector<4x256xf32>
    %c0_100 = arith.constant 0 : index
    %c143_101 = arith.constant 143 : index
    %120 = vector.load %arg15[%c0_100, %c143_101] : memref<4x512xf32, #tpu.memory_space<vmem>>, vector<4x256xf32>
    %121 = vector.broadcast %4 : vector<1x256xf32> to vector<4x256xf32>
    %122 = arith.mulf %120, %121 : vector<4x256xf32>
    %c6_102 = arith.constant 6 : index
    %c0_103 = arith.constant 0 : index
    %c0_104 = arith.constant 0 : index
    %123 = vector.load %arg10[%c6_102, %c0_103, %c0_104] : memref<9x4x4xf32, #tpu.memory_space<vmem>>, vector<1x4x4xf32>
    %124 = vector.shape_cast %123 : vector<1x4x4xf32> to vector<4x4xf32>
    %cst_105 = arith.constant dense<0.000000e+00> : vector<4x256xf32>
    %125 = tpu.matmul %124, %122, %cst_105 {dimension_numbers = #tpu.dot_dimension_numbers<[1], [0], [0], [1], [0, 0, 1, 1], [], []>} : vector<4x4xf32>, vector<4x256xf32>, vector<4x256xf32> -> vector<4x256xf32>
    %126 = arith.addf %119, %125 : vector<4x256xf32>
    %c0_106 = arith.constant 0 : index
    %c144_107 = arith.constant 144 : index
    %127 = vector.load %arg15[%c0_106, %c144_107] : memref<4x512xf32, #tpu.memory_space<vmem>>, vector<4x256xf32>
    %c7_108 = arith.constant 7 : index
    %c0_109 = arith.constant 0 : index
    %c0_110 = arith.constant 0 : index
    %128 = vector.load %arg10[%c7_108, %c0_109, %c0_110] : memref<9x4x4xf32, #tpu.memory_space<vmem>>, vector<1x4x4xf32>
    %129 = vector.shape_cast %128 : vector<1x4x4xf32> to vector<4x4xf32>
    %cst_111 = arith.constant dense<0.000000e+00> : vector<4x256xf32>
    %130 = tpu.matmul %129, %127, %cst_111 {dimension_numbers = #tpu.dot_dimension_numbers<[1], [0], [0], [1], [0, 0, 1, 1], [], []>} : vector<4x4xf32>, vector<4x256xf32>, vector<4x256xf32> -> vector<4x256xf32>
    %131 = arith.addf %126, %130 : vector<4x256xf32>
    %c0_112 = arith.constant 0 : index
    %c145_113 = arith.constant 145 : index
    %132 = vector.load %arg15[%c0_112, %c145_113] : memref<4x512xf32, #tpu.memory_space<vmem>>, vector<4x256xf32>
    %133 = vector.broadcast %5 : vector<1x256xf32> to vector<4x256xf32>
    %134 = arith.mulf %132, %133 : vector<4x256xf32>
    %c8_114 = arith.constant 8 : index
    %c0_115 = arith.constant 0 : index
    %c0_116 = arith.constant 0 : index
    %135 = vector.load %arg10[%c8_114, %c0_115, %c0_116] : memref<9x4x4xf32, #tpu.memory_space<vmem>>, vector<1x4x4xf32>
    %136 = vector.shape_cast %135 : vector<1x4x4xf32> to vector<4x4xf32>
    %cst_117 = arith.constant dense<0.000000e+00> : vector<4x256xf32>
    %137 = tpu.matmul %136, %134, %cst_117 {dimension_numbers = #tpu.dot_dimension_numbers<[1], [0], [0], [1], [0, 0, 1, 1], [], []>} : vector<4x4xf32>, vector<4x256xf32>, vector<4x256xf32> -> vector<4x256xf32>
    %138 = arith.addf %131, %137 : vector<4x256xf32>
    %c0_118 = arith.constant 0 : index
    %c0_119 = arith.constant 0 : index
    %139 = vector.load %arg11[%c0_118, %c0_119] : memref<4x1xf32, #tpu.memory_space<vmem>>, vector<4x1xf32>
    %140 = vector.broadcast %139 : vector<4x1xf32> to vector<4x256xf32>
    %141 = arith.addf %138, %140 : vector<4x256xf32>
    %cst_120 = arith.constant 0.000000e+00 : f32
    %142 = vector.broadcast %cst_120 : f32 to vector<4x256xf32>
    %143 = arith.maximumf %141, %142 : vector<4x256xf32>
    %c0_121 = arith.constant 0 : index
    %c128_122 = arith.constant 128 : index
    %144 = vector.load %arg15[%c0_121, %c128_122] : memref<4x512xf32, #tpu.memory_space<vmem>>, vector<4x256xf32>
    tpu.vector_store %arg15[%c0_121, %c128_122], %143 {strides = array<i32>} : memref<4x512xf32, #tpu.memory_space<vmem>>, vector<4x256xf32>,
    %c0_123 = arith.constant 0 : index
    %c111_124 = arith.constant 111 : index
    %145 = vector.load %arg15[%c0_123, %c111_124] : memref<4x512xf32, #tpu.memory_space<vmem>>, vector<4x256xf32>
    %146 = vector.broadcast %4 : vector<1x256xf32> to vector<4x256xf32>
    %147 = arith.mulf %145, %146 : vector<4x256xf32>
    %c0_125 = arith.constant 0 : index
    %c0_126 = arith.constant 0 : index
    %c0_127 = arith.constant 0 : index
    %148 = vector.load %arg12[%c0_125, %c0_126, %c0_127] : memref<9x16x4xf32, #tpu.memory_space<vmem>>, vector<1x16x4xf32>
    %149 = vector.shape_cast %148 : vector<1x16x4xf32> to vector<16x4xf32>
    %cst_128 = arith.constant dense<0.000000e+00> : vector<16x256xf32>
    %150 = tpu.matmul %149, %147, %cst_128 {dimension_numbers = #tpu.dot_dimension_numbers<[1], [0], [0], [1], [0, 0, 1, 1], [], []>} : vector<16x4xf32>, vector<4x256xf32>, vector<16x256xf32> -> vector<16x256xf32>
    %c0_129 = arith.constant 0 : index
    %c112_130 = arith.constant 112 : index
    %151 = vector.load %arg15[%c0_129, %c112_130] : memref<4x512xf32, #tpu.memory_space<vmem>>, vector<4x256xf32>
    %c1_131 = arith.constant 1 : index
    %c0_132 = arith.constant 0 : index
    %c0_133 = arith.constant 0 : index
    %152 = vector.load %arg12[%c1_131, %c0_132, %c0_133] : memref<9x16x4xf32, #tpu.memory_space<vmem>>, vector<1x16x4xf32>
    %153 = vector.shape_cast %152 : vector<1x16x4xf32> to vector<16x4xf32>
    %cst_134 = arith.constant dense<0.000000e+00> : vector<16x256xf32>
    %154 = tpu.matmul %153, %151, %cst_134 {dimension_numbers = #tpu.dot_dimension_numbers<[1], [0], [0], [1], [0, 0, 1, 1], [], []>} : vector<16x4xf32>, vector<4x256xf32>, vector<16x256xf32> -> vector<16x256xf32>
    %155 = arith.addf %150, %154 : vector<16x256xf32>
    %c0_135 = arith.constant 0 : index
    %c113_136 = arith.constant 113 : index
    %156 = vector.load %arg15[%c0_135, %c113_136] : memref<4x512xf32, #tpu.memory_space<vmem>>, vector<4x256xf32>
    %157 = vector.broadcast %5 : vector<1x256xf32> to vector<4x256xf32>
    %158 = arith.mulf %156, %157 : vector<4x256xf32>
    %c2_137 = arith.constant 2 : index
    %c0_138 = arith.constant 0 : index
    %c0_139 = arith.constant 0 : index
    %159 = vector.load %arg12[%c2_137, %c0_138, %c0_139] : memref<9x16x4xf32, #tpu.memory_space<vmem>>, vector<1x16x4xf32>
    %160 = vector.shape_cast %159 : vector<1x16x4xf32> to vector<16x4xf32>
    %cst_140 = arith.constant dense<0.000000e+00> : vector<16x256xf32>
    %161 = tpu.matmul %160, %158, %cst_140 {dimension_numbers = #tpu.dot_dimension_numbers<[1], [0], [0], [1], [0, 0, 1, 1], [], []>} : vector<16x4xf32>, vector<4x256xf32>, vector<16x256xf32> -> vector<16x256xf32>
    %162 = arith.addf %155, %161 : vector<16x256xf32>
    %c0_141 = arith.constant 0 : index
    %c127_142 = arith.constant 127 : index
    %163 = vector.load %arg15[%c0_141, %c127_142] : memref<4x512xf32, #tpu.memory_space<vmem>>, vector<4x256xf32>
    %164 = vector.broadcast %4 : vector<1x256xf32> to vector<4x256xf32>
    %165 = arith.mulf %163, %164 : vector<4x256xf32>
    %c3_143 = arith.constant 3 : index
    %c0_144 = arith.constant 0 : index
    %c0_145 = arith.constant 0 : index
    %166 = vector.load %arg12[%c3_143, %c0_144, %c0_145] : memref<9x16x4xf32, #tpu.memory_space<vmem>>, vector<1x16x4xf32>
    %167 = vector.shape_cast %166 : vector<1x16x4xf32> to vector<16x4xf32>
    %cst_146 = arith.constant dense<0.000000e+00> : vector<16x256xf32>
    %168 = tpu.matmul %167, %165, %cst_146 {dimension_numbers = #tpu.dot_dimension_numbers<[1], [0], [0], [1], [0, 0, 1, 1], [], []>} : vector<16x4xf32>, vector<4x256xf32>, vector<16x256xf32> -> vector<16x256xf32>
    %169 = arith.addf %162, %168 : vector<16x256xf32>
    %c0_147 = arith.constant 0 : index
    %c128_148 = arith.constant 128 : index
    %170 = vector.load %arg15[%c0_147, %c128_148] : memref<4x512xf32, #tpu.memory_space<vmem>>, vector<4x256xf32>
    %c4_149 = arith.constant 4 : index
    %c0_150 = arith.constant 0 : index
    %c0_151 = arith.constant 0 : index
    %171 = vector.load %arg12[%c4_149, %c0_150, %c0_151] : memref<9x16x4xf32, #tpu.memory_space<vmem>>, vector<1x16x4xf32>
    %172 = vector.shape_cast %171 : vector<1x16x4xf32> to vector<16x4xf32>
    %cst_152 = arith.constant dense<0.000000e+00> : vector<16x256xf32>
    %173 = tpu.matmul %172, %170, %cst_152 {dimension_numbers = #tpu.dot_dimension_numbers<[1], [0], [0], [1], [0, 0, 1, 1], [], []>} : vector<16x4xf32>, vector<4x256xf32>, vector<16x256xf32> -> vector<16x256xf32>
    %174 = arith.addf %169, %173 : vector<16x256xf32>
    %c0_153 = arith.constant 0 : index
    %c129_154 = arith.constant 129 : index
    %175 = vector.load %arg15[%c0_153, %c129_154] : memref<4x512xf32, #tpu.memory_space<vmem>>, vector<4x256xf32>
    %176 = vector.broadcast %5 : vector<1x256xf32> to vector<4x256xf32>
    %177 = arith.mulf %175, %176 : vector<4x256xf32>
    %c5_155 = arith.constant 5 : index
    %c0_156 = arith.constant 0 : index
    %c0_157 = arith.constant 0 : index
    %178 = vector.load %arg12[%c5_155, %c0_156, %c0_157] : memref<9x16x4xf32, #tpu.memory_space<vmem>>, vector<1x16x4xf32>
    %179 = vector.shape_cast %178 : vector<1x16x4xf32> to vector<16x4xf32>
    %cst_158 = arith.constant dense<0.000000e+00> : vector<16x256xf32>
    %180 = tpu.matmul %179, %177, %cst_158 {dimension_numbers = #tpu.dot_dimension_numbers<[1], [0], [0], [1], [0, 0, 1, 1], [], []>} : vector<16x4xf32>, vector<4x256xf32>, vector<16x256xf32> -> vector<16x256xf32>
    %181 = arith.addf %174, %180 : vector<16x256xf32>
    %c0_159 = arith.constant 0 : index
    %c143_160 = arith.constant 143 : index
    %182 = vector.load %arg15[%c0_159, %c143_160] : memref<4x512xf32, #tpu.memory_space<vmem>>, vector<4x256xf32>
    %183 = vector.broadcast %4 : vector<1x256xf32> to vector<4x256xf32>
    %184 = arith.mulf %182, %183 : vector<4x256xf32>
    %c6_161 = arith.constant 6 : index
    %c0_162 = arith.constant 0 : index
    %c0_163 = arith.constant 0 : index
    %185 = vector.load %arg12[%c6_161, %c0_162, %c0_163] : memref<9x16x4xf32, #tpu.memory_space<vmem>>, vector<1x16x4xf32>
    %186 = vector.shape_cast %185 : vector<1x16x4xf32> to vector<16x4xf32>
    %cst_164 = arith.constant dense<0.000000e+00> : vector<16x256xf32>
    %187 = tpu.matmul %186, %184, %cst_164 {dimension_numbers = #tpu.dot_dimension_numbers<[1], [0], [0], [1], [0, 0, 1, 1], [], []>} : vector<16x4xf32>, vector<4x256xf32>, vector<16x256xf32> -> vector<16x256xf32>
    %188 = arith.addf %181, %187 : vector<16x256xf32>
    %c0_165 = arith.constant 0 : index
    %c144_166 = arith.constant 144 : index
    %189 = vector.load %arg15[%c0_165, %c144_166] : memref<4x512xf32, #tpu.memory_space<vmem>>, vector<4x256xf32>
    %c7_167 = arith.constant 7 : index
    %c0_168 = arith.constant 0 : index
    %c0_169 = arith.constant 0 : index
    %190 = vector.load %arg12[%c7_167, %c0_168, %c0_169] : memref<9x16x4xf32, #tpu.memory_space<vmem>>, vector<1x16x4xf32>
    %191 = vector.shape_cast %190 : vector<1x16x4xf32> to vector<16x4xf32>
    %cst_170 = arith.constant dense<0.000000e+00> : vector<16x256xf32>
    %192 = tpu.matmul %191, %189, %cst_170 {dimension_numbers = #tpu.dot_dimension_numbers<[1], [0], [0], [1], [0, 0, 1, 1], [], []>} : vector<16x4xf32>, vector<4x256xf32>, vector<16x256xf32> -> vector<16x256xf32>
    %193 = arith.addf %188, %192 : vector<16x256xf32>
    %c0_171 = arith.constant 0 : index
    %c145_172 = arith.constant 145 : index
    %194 = vector.load %arg15[%c0_171, %c145_172] : memref<4x512xf32, #tpu.memory_space<vmem>>, vector<4x256xf32>
    %195 = vector.broadcast %5 : vector<1x256xf32> to vector<4x256xf32>
    %196 = arith.mulf %194, %195 : vector<4x256xf32>
    %c8_173 = arith.constant 8 : index
    %c0_174 = arith.constant 0 : index
    %c0_175 = arith.constant 0 : index
    %197 = vector.load %arg12[%c8_173, %c0_174, %c0_175] : memref<9x16x4xf32, #tpu.memory_space<vmem>>, vector<1x16x4xf32>
    %198 = vector.shape_cast %197 : vector<1x16x4xf32> to vector<16x4xf32>
    %cst_176 = arith.constant dense<0.000000e+00> : vector<16x256xf32>
    %199 = tpu.matmul %198, %196, %cst_176 {dimension_numbers = #tpu.dot_dimension_numbers<[1], [0], [0], [1], [0, 0, 1, 1], [], []>} : vector<16x4xf32>, vector<4x256xf32>, vector<16x256xf32> -> vector<16x256xf32>
    %200 = arith.addf %193, %199 : vector<16x256xf32>
    %c0_177 = arith.constant 0 : index
    %c0_178 = arith.constant 0 : index
    %201 = vector.load %arg13[%c0_177, %c0_178] : memref<16x1xf32, #tpu.memory_space<vmem>>, vector<16x1xf32>
    %202 = vector.broadcast %201 : vector<16x1xf32> to vector<16x256xf32>
    %203 = arith.addf %200, %202 : vector<16x256xf32>
    %cst_179 = arith.constant 2.500000e-01 : f32
    %204 = vector.broadcast %cst_179 : f32 to vector<16x256xf32>
    %205 = arith.mulf %204, %203 : vector<16x256xf32>
    %206 = arith.addf %10, %205 : vector<16x256xf32>
    %c0_180 = arith.constant 0 : index
    %c0_181 = arith.constant 0 : index
    %c0_182 = arith.constant 0 : index
    %207 = vector.load %arg14[%c0_180, %c0_181, %c0_182] : memref<1x16x256xf32, #tpu.memory_space<vmem>>, vector<1x16x256xf32>
    %208 = vector.shape_cast %207 : vector<1x16x256xf32> to vector<16x256xf32>
    %209 = vector.shape_cast %206 : vector<16x256xf32> to vector<1x16x256xf32>
    tpu.vector_store %arg14[%c0_180, %c0_181, %c0_182], %209 {strides = array<i32>} : memref<1x16x256xf32, #tpu.memory_space<vmem>>, vector<1x16x256xf32>,
    return
  }
  func.func @transform_0(%arg0: i32) -> (i32, i32, i32) {
    %c0_i32 = arith.constant 0 : i32
    %c0_i32_0 = arith.constant 0 : i32
    %c0_i32_1 = arith.constant 0 : i32
    return %arg0, %c0_i32, %c0_i32_0 : i32, i32, i32
  }
  func.func @transform_1(%arg0: i32) -> (i32, i32) {
    %c0_i32 = arith.constant 0 : i32
    %c0_i32_0 = arith.constant 0 : i32
    %c0_i32_1 = arith.constant 0 : i32
    return %c0_i32, %c0_i32_0 : i32, i32
  }
  func.func @transform_2(%arg0: i32) -> (i32, i32) {
    %c0_i32 = arith.constant 0 : i32
    %c0_i32_0 = arith.constant 0 : i32
    %c0_i32_1 = arith.constant 0 : i32
    return %c0_i32, %c0_i32_0 : i32, i32
  }
  func.func @transform_3(%arg0: i32) -> (i32, i32) {
    %c0_i32 = arith.constant 0 : i32
    %c0_i32_0 = arith.constant 0 : i32
    %c0_i32_1 = arith.constant 0 : i32
    return %c0_i32, %c0_i32_0 : i32, i32
  }
  func.func @transform_4(%arg0: i32) -> (i32, i32) {
    %c0_i32 = arith.constant 0 : i32
    %c0_i32_0 = arith.constant 0 : i32
    %c0_i32_1 = arith.constant 0 : i32
    return %c0_i32, %c0_i32_0 : i32, i32
  }
  func.func @transform_5(%arg0: i32) -> (i32, i32) {
    %c0_i32 = arith.constant 0 : i32
    %c0_i32_0 = arith.constant 0 : i32
    %c0_i32_1 = arith.constant 0 : i32
    return %c0_i32, %c0_i32_0 : i32, i32
  }
  func.func @transform_6(%arg0: i32) -> (i32, i32) {
    %c0_i32 = arith.constant 0 : i32
    %c0_i32_0 = arith.constant 0 : i32
    %c0_i32_1 = arith.constant 0 : i32
    return %c0_i32, %c0_i32_0 : i32, i32
  }
  func.func @transform_7(%arg0: i32) -> (i32, i32, i32) {
    %c0_i32 = arith.constant 0 : i32
    %c0_i32_0 = arith.constant 0 : i32
    %c0_i32_1 = arith.constant 0 : i32
    %c0_i32_2 = arith.constant 0 : i32
    return %c0_i32, %c0_i32_0, %c0_i32_1 : i32, i32, i32
  }
  func.func @transform_8(%arg0: i32) -> (i32, i32) {
    %c0_i32 = arith.constant 0 : i32
    %c0_i32_0 = arith.constant 0 : i32
    %c0_i32_1 = arith.constant 0 : i32
    return %c0_i32, %c0_i32_0 : i32, i32
  }
  func.func @transform_9(%arg0: i32) -> (i32, i32, i32) {
    %c0_i32 = arith.constant 0 : i32
    %c0_i32_0 = arith.constant 0 : i32
    %c0_i32_1 = arith.constant 0 : i32
    %c0_i32_2 = arith.constant 0 : i32
    return %c0_i32, %c0_i32_0, %c0_i32_1 : i32, i32, i32
  }
  func.func @transform_10(%arg0: i32) -> (i32, i32) {
    %c0_i32 = arith.constant 0 : i32
    %c0_i32_0 = arith.constant 0 : i32
    %c0_i32_1 = arith.constant 0 : i32
    return %c0_i32, %c0_i32_0 : i32, i32
  }
  func.func @transform_11(%arg0: i32) -> (i32, i32, i32) {
    %c0_i32 = arith.constant 0 : i32
    %c0_i32_0 = arith.constant 0 : i32
    %c0_i32_1 = arith.constant 0 : i32
    %c0_i32_2 = arith.constant 0 : i32
    return %c0_i32, %c0_i32_0, %c0_i32_1 : i32, i32, i32
  }
  func.func @transform_12(%arg0: i32) -> (i32, i32) {
    %c0_i32 = arith.constant 0 : i32
    %c0_i32_0 = arith.constant 0 : i32
    %c0_i32_1 = arith.constant 0 : i32
    return %c0_i32, %c0_i32_0 : i32, i32
  }
  func.func @transform_13(%arg0: i32) -> (i32, i32, i32) {
    %c0_i32 = arith.constant 0 : i32
    %c0_i32_0 = arith.constant 0 : i32
    %c0_i32_1 = arith.constant 0 : i32
    return %arg0, %c0_i32, %c0_i32_0 : i32, i32, i32
  }
}

</mosaic_0001>

<bundles_post_ra>
// kernel: tpu_custom_call.1
= control target key start
LH: loop header
LB: loop body
LE: loop exit
PB: predicated region body
PF: predicated region fallthrough
CT: control target
= control target key end

     0   :  { %s4535_s0 = inlined_call_operand.vmem [shape: f32[2,4,256], index: 0, kind: input, shape index: {}]   ;;  %s4536_s1 = inlined_call_operand.vmem [shape: f32[1,256], index: 1, kind: input, shape index: {}]   ;;  %s4537_s2 = inlined_call_operand.vmem [shape: f32[1,256], index: 2, kind: input, shape index: {}]   ;;  %s4538_s3 = inlined_call_operand.vmem [shape: f32[16,4], index: 3, kind: input, shape index: {}]   ;;  %s4539_s4 = inlined_call_operand.vmem [shape: f32[16,1], index: 4, kind: input, shape index: {}]   ;;  %s4540_s5 = inlined_call_operand.vmem [shape: f32[4,4], index: 5, kind: input, shape index: {}]   ;;  %s4541_s6 = inlined_call_operand.vmem [shape: f32[4,1], index: 6, kind: input, shape index: {}]   ;;  %s4542_s7 = inlined_call_operand.vmem [shape: f32[9,4,4], index: 7, kind: input, shape index: {}]   ;;  %s4543_s8 = inlined_call_operand.vmem [shape: f32[4,1], index: 8, kind: input, shape index: {}]   ;;  %s4544_s9 = inlined_call_operand.vmem [shape: f32[9,4,4], index: 9, kind: input, shape index: {}]   ;;  %s4545_s10 = inlined_call_operand.vmem [shape: f32[4,1], index: 10, kind: input, shape index: {}]   ;;  %s4546_s11 = inlined_call_operand.vmem [shape: f32[9,16,4], index: 11, kind: input, shape index: {}]   ;;  %s4547_s12 = inlined_call_operand.vmem [shape: f32[16,1], index: 12, kind: input, shape index: {}]   ;;  %s4548_s13 = inlined_call_operand.hbm [shape: f32[2,16,256], index: 13, kind: output, shape index: {}]  }
   0x1   :  { %4562 = sst [smem:[#allocation6_spill]] %s4535_s0 }
   0x2   :  { %4563 = sst [smem:[#allocation7_spill]] %s4536_s1 }
   0x3   :  { %4564 = sst [smem:[#allocation8_spill]] %s4541_s6 }
   0x4   :  { %18 = vsyncpa [#allocation4], 0 }
   0x5   :  { %20 = vsyncpa [#allocation4 + $0x1], 0  ;;  %s3908_s25 = smov 0   ;;  %s3910_s26 = smov 0  }
   0x6   :  { %s3912_s27 = smov 0   ;;  %s3914_s28 = smov 0  }
   0x7 LB: > { %s3929_s29 = sadd.s32 4294967295, %s3824_s28   ;;  %s3496_s30 = sadd.s32 4294967294, %s3824_s28   ;;  %s3824_s28 = sphi %s3914_s28, %s4580_s28   ;;  %s3820_s27 = sphi %s3912_s27, %s4579_s27   ;;  %s3816_s26 = sphi %s3910_s26, %s4578_s26   ;;  %s3812_s25 = sphi %s3908_s25, %s4577_s25  }
   0x8   : > { %s3933_s14 = sadd.s32 1, %s3824_s28   ;;  %s311_s15 = sadd.s32 1, %s3820_s27 }
   0x9   : > { %s308_s16 = ssub.s32 %s3824_s28, %s3933_s14  ;;  %p321_p0 = scmp.ne.s32.totalorder %s3820_s27, %s3816_s26 }
   0xa   : > { %p309_p1 = scmp.eq.s32.totalorder %s308_s16, 0  ;;  %p322_p2 = scmp.eq.s32.totalorder %s3929_s29, 1 }
   0xb   : > { %p327_p3 = scmp.ne.s32.totalorder %s3816_s26, %s3812_s25  ;;  %p328_p4 = scmp.eq.s32.totalorder %s3496_s30, 1 }
   0xc   : > { %s3944_s17 = scalar_select %p309_p1, %s3820_s27, %s311_s15  }
   0xd   : > { %p3946_p5 = por %p322_p2, %p321_p0  ;;  %p3950_p6 = por %p328_p4, %p327_p3 }
   0xe   : > { %p3499_p7 = scmp.ge.s32.totalorder %s3824_s28, 1  ;;  %p390_p8 = scmp.lt.s32.totalorder %s3824_s28, 3 }
  0x10   : > { %p391_p9 = pnand %p3499_p7, %p390_p8 }
  0x11   : > { %p434_p10 = scmp.lt.s32.totalorder (!%p391_p9), %s3929_s29, 1  ;;  %v647_v0 = vlaneseq (!%p391_p9)  ;;  %v3826_v1 = vmov (!%p391_p9), 0.0   ;;  %s4567_s6 = sld [smem:[#allocation8_spill]] (!%p391_p9)  ;;  %v3827_v3 = vmov (!%p391_p9), 0   ;;  %v443_v5 = vld [vmem:[%s4537_s2] sm:$0x3] (!%p391_p9) }
  0x12   : > { %394 = sbr.rel (%p391_p9) target bundleno = 1492 (0x5d4), region = 72  ;;  %630 = vmatprep.mubr.f32.mxu1 (!%p391_p9), %v3826_v1  ;;  %439 = vst [vmem:[#allocation2] sm:$0xff] (!%p391_p9), %v3826_v1  ;;  %440 = vst [vmem:[#allocation2 + $0x8] sm:$0xff] (!%p391_p9), %v3826_v1  ;;  %536 = vmatprep.mubr.f32.mxu0 (!%p391_p9), %v3826_v1  ;;  %s4568_s1 = sld [smem:[#allocation7_spill]] (!%p391_p9)  ;;  %vm467_vm0 = vcmask (!%p391_p9), 1043456   ;;  %vm460_vm1 = vcmask (!%p391_p9), 31744  }
  0x13   : > { %3753 = vset.pattern.permute.xlu0 (!%p391_p9), %v3827_v3  ;;  %v648_v4 = vshrl.u32 (!%p391_p9), %v647_v0, 7  ;;  %3754 = vset.pattern.permute.xlu1 (!%p391_p9), %v3827_v3  ;;  %s4569_s0 = sld [smem:[#allocation6_spill]] (!%p391_p9)  ;;  %v550_v18 = vld [vmem:[%s4540_s5] sm:$0xf] (!%p391_p9)  ;;  %s4549_s24 = smov (!%p391_p9), 113   ;;  %vm659_vm2 = vcmask (!%p391_p9), 908288  }
  0x14   : > { %s4553_s30 = smov (!%p391_p9), 127   ;;  %s4555_s15 = smov (!%p391_p9), 1   ;;  %vm863_vm3 = vcmask (!%p391_p9), 924672   ;;  %vm968_vm4 = vcmask (!%p391_p9), 1039360   ;;  %vm985_vm5 = vcmask (!%p391_p9), 7168   ;;  %vm880_vm6 = vcmask (!%p391_p9), 121856  }
  0x15   : > { %v649_v7 = vsub.s32 (!%p391_p9), 0, %v648_v4  ;;  %v653_v8 = vsub.s32 (!%p391_p9), 1, %v648_v4  ;;  %s3833_s20 = smov (!%p391_p9), 17   ;;  %s4561_s21 = smov (!%p391_p9), 16   ;;  %vm767_vm7 = vcmask (!%p391_p9), 138240   ;;  %vm677_vm8 = vcmask (!%p391_p9), 130048  }
  0x16   : > { %vm1372_vm9 = vcmask (!%p391_p9), 916480   ;;  %s4574_s23 = smov (!%p391_p9), 1  }
  0x17   : > { %v551_v2 = vld [vmem:[%s4567_s6] sm:$0xf] (!%p391_p9)  ;;  %v854_v10 = vrot.slane (!%p391_p9), %v443_v5, %v649_v7  ;;  %v858_v11 = vrot.slane (!%p391_p9), %v443_v5, %v653_v8 }
  0x18   : > { %554 = vperm.xlu0 (!%p391_p9), %3753, %v551_v2   ;;  %v442_v6 = vld [vmem:[%s4568_s1] sm:$0x3] (!%p391_p9) }
  0x19   : > { %s435_s22 = scalar_select %p434_p10, %s3929_s29, 1  ;;  %v650_v12 = vrot.slane %v442_v6, %v649_v7  ;;  %v654_v13 = vrot.slane %v442_v6, %v653_v8  ;;  %v859_v15 = vcombine.low %v854_v10, %v858_v11  ;;  %v1154_v54 = vld [vmem:[#allocation2 + $0xc] sm:$0xf]  ;;  %v1558_v11 = vld [vmem:[%s4543_s8] sm:$0xf] }
  0x1a   : > { %v1257_v0 = vld [vmem:[#allocation2 + $0xc] sm:$0xf] }
  0x1b   : > { %s3637_s16 = sshll.u32 %s435_s22, 3  ;;  %v655_v16 = vcombine.low %v650_v12, %v654_v13  ;;  %860 = vrot.lane.b32.xlu1 %v859_v15, %s4549_s24  ;;  %v1360_v4 = vld [vmem:[#allocation2 + $0xc] sm:$0xf]  ;;  %s4551_s22 = smov 112  }
  0x1c   : > { %s438_s6 = scalar_lea.vmem %s4569_s0, %s3637_s16  ;;  %s4559_s16 = smov 15   ;;  %v1456_v8 = vld [vmem:[#allocation2 + $0xc] sm:$0xf] }
  0x1d   : > { %v3974_v9 = vld [vmem:[%s438_s6] sm:$0xff]  ;;  %s4557_s6 = smov 111  }
  0x1e   : > { %v549_v14 = vmax.f32 %v3974_v9, 0.0  ;;  %656 = vrot.lane.b32.xlu0 %v655_v16, %s4557_s6 }
  0x1f   : > { %965 = vrot.lane.b32.xlu1 %v655_v16, %s4553_s30 }
  0x20   : > { %v558_v17 = vcombine.high %v549_v14, %v549_v14 }
  0x22   : > { %3507 = vmatprep.subr.msk.mxu1 %vm467_vm0, %v558_v17  ;;  %1155 = vrot.lane.b32.xlu0 %v859_v15, %s4555_s15  ;;  %v3510_v17 = vld [vmem:[%s4542_s7 + $0x4] sm:$0xf] }
  0x23   : > { %3508 = vmatpush1.msk.msra.mxu1 %vm467_vm0, %v549_v14  ;;  %1258 = vrot.lane.b32.xlu1 %v655_v16, %s4559_s16 }
  0x24   : > { %3509 = vmatmul.mubr.msk.f32.vlgmr.msra.gmra.mrb[0].mxu1 %vm460_vm1, %v550_v18 }
  0x25   : > { %751 = vmatprep.mubr.f32.mxu1 %v3826_v1 }
  0x26   : > { %1457 = vrot.lane.b32.xlu0 %v859_v15, %s3833_s20 }
  0x8d   : > { %v861_v29 = vpop.permute.xlu1 %860 }
  0x8e   : > { %v4004_v35 = vrot.slane %v861_v29, 4 }
  0x90   : > { %v4012_v39 = vsel %vm863_vm3, %v4004_v35, %v861_v29 }
  0x91   : > { %v966_v36 = vpop.permute.xlu1 %965 }
  0x92   : > { %v4007_v38 = vrot.slane %v966_v36, 4 }
  0x94   : > { %v4017_v40 = vsel %vm968_vm4, %v4007_v38, %v966_v36  ;;  %v3517_v36 = vld [vmem:[%s4542_s7 + $0x8] sm:$0xf] }
  0x95   : > { %v1259_v47 = vpop.permute.xlu1 %1258 }
  0x96   : > { %v4029_v51 = vrot.slane %v1259_v47, 4 }
  0x97   : > { %v555_v19 = vpop.permute.xlu0 %554 }
  0x98   : > { %v4039_v55 = vsel %vm880_vm6, %v4029_v51, %v1259_v47  ;;  %v1265_v2 = vmul.f32 %v4029_v51, %v1257_v0 }
  0x9b   : > { %v657_v27 = vpop.permute.xlu0 %656 }
  0x9c   : > { %v3996_v28 = vrot.slane %v657_v27, 4 }
  0x9e   : > { %v4000_v30 = vsel %vm659_vm2, %v3996_v28, %v657_v27 }
  0x9f   : > { %v1156_v46 = vpop.permute.xlu0 %1155 }
  0xa0   : > { %v4026_v49 = vrot.slane %v1156_v46, 4 }
  0xa2   : > { %v4034_v52 = vsel %vm985_vm5, %v4026_v49, %v1156_v46  ;;  %v1162_v58 = vmul.f32 %v4026_v49, %v1154_v54 }
  0xa3   : > { %v1458_v60 = vpop.permute.xlu0 %1457 }
  0xa4   : > { %v4051_v63 = vrot.slane %v1458_v60, 4 }
  0xa6   : > { %v4058_v3 = vsel %vm767_vm7, %v4051_v63, %v1458_v60  ;;  %v1464_v10 = vmul.f32 %v4051_v63, %v1456_v8 }
  0xf7   : > { %v632_v20 = vpop.f32.mrb[0].mxu1 }
  0xf8   : > { %v633_v21 = vadd.f32 %v632_v20, %v555_v19  ;;  %v634_v22 = vpop.f32.mrb[1].mxu1 }
  0xf9   : > { %v635_v23 = vadd.f32 %v634_v22, %v555_v19 }
  0xfa   : > { %v637_v24 = vmax.f32 %v633_v21, 0.0 }
  0xfb   : > { %v3990_v25 = vmax.f32 %v635_v23, 0.0 }
  0xfd   : > { %v3993_v26 = vcombine.low %v637_v24, %v3990_v25  ;;  %v3759_v6 = vcombine.low %v3990_v25, %v3990_v25  ;;  %v665_v25 = vld [vmem:[%s4542_s7] sm:$0xf] }
  0xff   : > { %643 = vst [vmem:[#allocation2 + $0x4] sm:$0xff] %v3993_v26  ;;  %v1161_v56 = vmul.f32 %v4034_v52, %v3993_v26  ;;  %v1264_v59 = vmul.f32 %v4039_v55, %v3993_v26  ;;  %v1463_v5 = vmul.f32 %v4058_v3, %v3993_v26 }
 0x101   : > { %v1167_v61 = vcombine.high %v1161_v56, %v1161_v56  ;;  %v1270_v62 = vcombine.high %v1264_v59, %v1264_v59  ;;  %v1469_v7 = vcombine.high %v1463_v5, %v1463_v5 }
 0x106   : > { %v848_v31 = vld [vmem:[#allocation2] sm:$0xff]  ;;  %v645_v32 = vld [vmem:[#allocation2 + $0x8] sm:$0xf] }
 0x107   : > { %v663_v33 = vmul.f32 %v848_v31, %v4000_v30  ;;  %675 = vrot.lane.b32.xlu0 %v645_v32, %s4561_s21  ;;  %v670_v34 = vcombine.high %v848_v31, %v848_v31  ;;  %v849_v41 = vld [vmem:[#allocation2 + $0x8] sm:$0xf]  ;;  %v867_v42 = vmul.f32 %v4012_v39, %v848_v31  ;;  %v664_v43 = vmul.f32 %v3996_v28, %v645_v32 }
 0x108   : > { %v972_v44 = vmul.f32 %v4017_v40, %v848_v31  ;;  %v868_v45 = vmul.f32 %v4004_v35, %v849_v41  ;;  %v964_v53 = vld [vmem:[#allocation2 + $0x8] sm:$0xf] }
 0x109   : > { %673 = vrot.lane.b32.xlu1 %v670_v34, %s4561_s21  ;;  %v760_v37 = vcombine.high %v663_v33, %v663_v33  ;;  %v873_v48 = vcombine.high %v867_v42, %v867_v42  ;;  %v973_v57 = vmul.f32 %v4007_v38, %v964_v53 }
 0x10a   : > { %v978_v50 = vcombine.high %v972_v44, %v972_v44 }
 0x10b   : > { %763 = vrot.lane.b32.xlu0 %v760_v37, %s3833_s20 }
 0x10d   : > { %671 = vrot.lane.b32.xlu1 %v848_v31, %s4561_s21 }
 0x10f   : > { %761 = vrot.lane.b32.xlu0 %v663_v33, %s3833_s20 }
 0x111   : > { %765 = vrot.lane.b32.xlu1 %v664_v43, %s3833_s20  ;;  %v3521_v43 = vld [vmem:[%s4542_s7 + $0xc] sm:$0xf] }
 0x113   : > { %878 = vrot.lane.b32.xlu0 %v868_v45, %s4559_s16 }
 0x115   : > { %876 = vrot.lane.b32.xlu1 %v873_v48, %s4559_s16 }
 0x117   : > { %981 = vrot.lane.b32.xlu0 %v978_v50, %s4555_s15  ;;  %v3525_v50 = vld [vmem:[%s4542_s7 + $0x10] sm:$0xf] }
 0x119   : > { %874 = vrot.lane.b32.xlu1 %v867_v42, %s4559_s16 }
 0x11b   : > { %979 = vrot.lane.b32.xlu0 %v972_v44, %s4555_s15 }
 0x11d   : > { %983 = vrot.lane.b32.xlu1 %v973_v57, %s4555_s15  ;;  %v3529_v57 = vld [vmem:[%s4542_s7 + $0x14] sm:$0xf] }
 0x11f   : > { %1172 = vrot.lane.b32.xlu0 %v1162_v58, %s4553_s30 }
 0x121   : > { %1170 = vrot.lane.b32.xlu1 %v1167_v61, %s4553_s30 }
 0x123   : > { %1273 = vrot.lane.b32.xlu0 %v1270_v62, %s4549_s24  ;;  %v3533_v62 = vld [vmem:[%s4542_s7 + $0x18] sm:$0xf] }
 0x125   : > { %1168 = vrot.lane.b32.xlu1 %v1161_v56, %s4553_s30  ;;  %s4571_s30 = smov 113  }
 0x127   : > { %1271 = vrot.lane.b32.xlu0 %v1264_v59, %s4549_s24 }
 0x129   : > { %1275 = vrot.lane.b32.xlu1 %v1265_v2, %s4549_s24  ;;  %s4570_s24 = smov 127  }
 0x12b   : > { %1370 = vrot.lane.b32.xlu0 %v1360_v4, %s4551_s22 }
 0x12d   : > { %1368 = vrot.lane.b32.xlu1 %v3759_v6, %s4551_s22 }
 0x12f   : > { %1472 = vrot.lane.b32.xlu0 %v1469_v7, %s4557_s6  ;;  %v3537_v7 = vld [vmem:[%s4542_s7 + $0x1c] sm:$0xf] }
 0x131   : > { %1366 = vrot.lane.b32.xlu1 %v3993_v26, %s4551_s22  ;;  %s4572_s22 = smov 112  }
 0x133   : > { %1470 = vrot.lane.b32.xlu0 %v1463_v5, %s4557_s6 }
 0x135   : > { %1474 = vrot.lane.b32.xlu1 %v1464_v10, %s4557_s6  ;;  %v3541_v10 = vld [vmem:[%s4542_s7 + $0x20] sm:$0xf] }
 0x139   : > { %1561 = vperm.xlu1 %3754, %v1558_v11   ;;  %v459_v11 = vcombine.high %v3974_v9, %v3974_v9 }
 0x13b   : > { %3503 = vmatprep.subr.msk.mxu0 %vm467_vm0, %v459_v11 }
 0x13c   : > { %3504 = vmatpush1.msk.msra.mxu0 %vm467_vm0, %v3974_v9  ;;  %v445_v9 = vld [vmem:[%s4538_s3 + $0x8] sm:$0xff] }
 0x179   : > { %v676_v12 = vpop.permute.xlu0 %675 }
 0x17b   : > { %v674_v13 = vpop.permute.xlu1 %673 }
 0x17c   : > { %v679_v14 = vsel %vm677_vm8, %v674_v13, %v676_v12 }
 0x17d   : > { %3511 = vmatprep.subr.msk.mxu1 %vm467_vm0, %v679_v14  ;;  %v764_v15 = vpop.permute.xlu0 %763 }
 0x17f   : > { %v672_v16 = vpop.permute.xlu1 %671 }
 0x180   : > { %v678_v18 = vsel %vm677_vm8, %v672_v16, %v674_v13 }
 0x181   : > { %3512 = vmatpush1.msk.msra.mxu1 %vm467_vm0, %v678_v18  ;;  %v762_v19 = vpop.permute.xlu0 %761 }
 0x182   : > { %3513 = vmatmul.mubr.msk.f32.vlgmr.msra.gmra.mrb[2].mxu1 %vm460_vm1, %v3510_v17  ;;  %v768_v22 = vsel %vm767_vm7, %v762_v19, %v764_v15  ;;  %v444_v17 = vld [vmem:[%s4538_s3] sm:$0xff] }
 0x183   : > { %v766_v20 = vpop.permute.xlu1 %765  ;;  %841 = vmatprep.mubr.f32.mxu1 %v3826_v1  ;;  %3505 = vmatmul.mubr.msk.f32.vlgmr.msra.gmra.mrb[0].mxu0 %vm460_vm1, %v444_v17 }
 0x184   : > { %v769_v21 = vsel %vm767_vm7, %v764_v15, %v766_v20  ;;  %542 = vmatprep.mubr.f32.mxu0 %v3826_v1 }
 0x185   : > { %3514 = vmatprep.subr.msk.mxu1 %vm467_vm0, %v769_v21  ;;  %v879_v23 = vpop.permute.xlu0 %878 }
 0x186   : > { %3515 = vmatpush1.msk.msra.mxu1 %vm467_vm0, %v768_v22 }
 0x187   : > { %v877_v24 = vpop.permute.xlu1 %876  ;;  %3506 = vmatmul.mubr.msk.f32.gmra.mrb[2].mxu0 %vm460_vm1, %v445_v9 }
 0x188   : > { %v882_v27 = vsel %vm880_vm6, %v877_v24, %v879_v23  ;;  %1662 = vmatprep.mubr.f32.mxu0 %v3826_v1 }
 0x189   : > { %3518 = vmatprep.subr.msk.mxu1 %vm467_vm0, %v882_v27  ;;  %v982_v29 = vpop.permute.xlu0 %981 }
 0x18a   : > { %3516 = vmatmul.mubr.msk.f32.vlgmr.msra.gmra.mrb[2].mxu1 %vm460_vm1, %v665_v25 }
 0x18b   : > { %v875_v31 = vpop.permute.xlu1 %874  ;;  %954 = vmatprep.mubr.f32.mxu1 %v3826_v1 }
 0x18c   : > { %v881_v32 = vsel %vm880_vm6, %v875_v31, %v877_v24 }
 0x18d   : > { %3519 = vmatpush1.msk.msra.mxu1 %vm467_vm0, %v881_v32  ;;  %v980_v33 = vpop.permute.xlu0 %979 }
 0x18e   : > { %v986_v41 = vsel %vm985_vm5, %v980_v33, %v982_v29 }
 0x18f   : > { %v984_v34 = vpop.permute.xlu1 %983 }
 0x190   : > { %v987_v37 = vsel %vm985_vm5, %v982_v29, %v984_v34 }
 0x191   : > { %3522 = vmatprep.subr.msk.mxu1 %vm467_vm0, %v987_v37  ;;  %v1173_v44 = vpop.permute.xlu0 %1172 }
 0x192   : > { %3520 = vmatmul.mubr.msk.f32.vlgmr.msra.gmra.mrb[2].mxu1 %vm460_vm1, %v3517_v36 }
 0x193   : > { %3523 = vmatpush1.msk.msra.mxu1 %vm467_vm0, %v986_v41  ;;  %v1171_v42 = vpop.permute.xlu1 %1170  ;;  %1059 = vmatprep.mubr.f32.mxu1 %v3826_v1  ;;  %v2038_v41 = vld [vmem:[#allocation2 + $0xc] sm:$0xf] }
 0x194   : > { %3526 = vmatprep.subr.msk.mxu1 %vm467_vm0, %v3759_v6  ;;  %v1175_v46 = vsel %vm968_vm4, %v1171_v42, %v1173_v44  ;;  %v2040_v44 = vmul.f32 %v2038_v41, %v4026_v49 }
 0x195   : > { %v1274_v47 = vpop.permute.xlu0 %1273 }
 0x197   : > { %v1169_v45 = vpop.permute.xlu1 %1168 }
 0x198   : > { %v1174_v53 = vsel %vm968_vm4, %v1169_v45, %v1171_v42 }
 0x19a   : > { %3524 = vmatmul.mubr.msk.f32.vlgmr.msra.gmra.mrb[2].mxu1 %vm460_vm1, %v3521_v43 }
 0x19b   : > { %3527 = vmatpush1.msk.msra.mxu1 %vm467_vm0, %v3993_v26  ;;  %1144 = vmatprep.mubr.f32.mxu1 %v3826_v1  ;;  %v1276_v48 = vpop.permute.xlu1 %1275  ;;  %v1272_v26 = vpop.permute.xlu0 %1271 }
 0x19c   : > { %3530 = vmatprep.subr.msk.mxu1 %vm467_vm0, %v1175_v46  ;;  %v1278_v54 = vsel %vm863_vm3, %v1274_v47, %v1276_v48  ;;  %v1277_v58 = vsel %vm863_vm3, %v1272_v26, %v1274_v47  ;;  %v2135_v48 = vld [vmem:[#allocation2 + $0xc] sm:$0xf] }
 0x19f   : > { %v1369_v56 = vpop.permute.xlu1 %1368  ;;  %v1371_v59 = vpop.permute.xlu0 %1370 }
 0x1a0   : > { %v1374_v61 = vsel %vm1372_vm9, %v1369_v56, %v1371_v59  ;;  %v2423_v59 = vld [vmem:[%s4545_s10] sm:$0xf] }
 0x1a2   : > { %3528 = vmatmul.mubr.msk.f32.vlgmr.msra.gmra.mrb[2].mxu1 %vm460_vm1, %v3525_v50  ;;  %v2137_v50 = vmul.f32 %v2135_v48, %v4029_v51  ;;  %v3568_v48 = vld [vmem:[%s4544_s9 + $0x18] sm:$0xf] }
 0x1a3   : > { %3531 = vmatpush1.msk.msra.mxu1 %vm467_vm0, %v1174_v53  ;;  %1247 = vmatprep.mubr.f32.mxu1 %v3826_v1  ;;  %v1367_v60 = vpop.permute.xlu1 %1366  ;;  %v1473_v2 = vpop.permute.xlu0 %1472  ;;  %v2232_v53 = vld [vmem:[#allocation2 + $0xc] sm:$0xf] }
 0x1a4   : > { %3534 = vmatprep.subr.msk.mxu1 %vm467_vm0, %v1278_v54  ;;  %v1373_v4 = vsel %vm1372_vm9, %v1367_v60, %v1369_v56  ;;  %v2959_v60 = vld [vmem:[#allocation2 + $0xc] sm:$0xf] }
 0x1a7   : > { %v1475_v0 = vpop.permute.xlu1 %1474  ;;  %v1471_v6 = vpop.permute.xlu0 %1470 }
 0x1a8   : > { %v1477_v5 = vsel %vm659_vm2, %v1473_v2, %v1475_v0  ;;  %v1476_v8 = vsel %vm659_vm2, %v1471_v6, %v1473_v2 }
 0x1aa   : > { %3532 = vmatmul.mubr.msk.f32.vlgmr.msra.gmra.mrb[2].mxu1 %vm460_vm1, %v3529_v57  ;;  %v2327_v57 = vld [vmem:[#allocation2 + $0xc] sm:$0xf] }
 0x1ab   : > { %3535 = vmatpush1.msk.msra.mxu1 %vm467_vm0, %v1277_v58  ;;  %1350 = vmatprep.mubr.f32.mxu1 %v3826_v1  ;;  %v2329_v58 = vmul.f32 %v2327_v57, %v4051_v63  ;;  %v3572_v57 = vld [vmem:[%s4544_s9 + $0x1c] sm:$0xf] }
 0x1ac   : > { %3538 = vmatprep.subr.msk.mxu1 %vm467_vm0, %v1374_v61  ;;  %v2961_v61 = vmul.f32 %v2959_v60, %v4026_v49 }
 0x1b2   : > { %3536 = vmatmul.mubr.msk.f32.vlgmr.msra.gmra.mrb[2].mxu1 %vm460_vm1, %v3533_v62  ;;  %v3068_v62 = vld [vmem:[#allocation2 + $0xc] sm:$0xf] }
 0x1b3   : > { %3539 = vmatpush1.msk.msra.mxu1 %vm467_vm0, %v1373_v4  ;;  %1446 = vmatprep.mubr.f32.mxu1 %v3826_v1  ;;  %v3070_v0 = vmul.f32 %v3068_v62, %v4029_v51 }
 0x1b4   : > { %3542 = vmatprep.subr.msk.mxu1 %vm467_vm0, %v1477_v5 }
 0x1b8   : > { %v1562_v12 = vpop.permute.xlu1 %1561 }
 0x1ba   : > { %3540 = vmatmul.mubr.msk.f32.vlgmr.msra.gmra.mrb[2].mxu1 %vm460_vm1, %v3537_v7 }
 0x1bb   : > { %3543 = vmatpush1.msk.msra.mxu1 %vm467_vm0, %v1476_v8  ;;  %1549 = vmatprep.mubr.f32.mxu1 %v3826_v1  ;;  %v3545_v8 = vld [vmem:[%s4544_s9 + $0x4] sm:$0xf] }
 0x1c2   : > { %3544 = vmatmul.mubr.msk.f32.vlgmr.msra.gmra.mrb[2].mxu1 %vm460_vm1, %v3541_v10 }
 0x1c3   : > { %2941 = vmatprep.mubr.f32.mxu1 %v3826_v1 }
 0x256   : > { %v4302_v60 = vpop.f32.mrb[0].mxu0 }
 0x295   : > { %v1551_v13 = vpop.f32.mrb[2].mxu1 }
 0x296   : > { %v1564_v14 = vadd.f32 %v1562_v12, %v1551_v13  ;;  %v1553_v15 = vpop.f32.mrb[3].mxu1 }
 0x297   : > { %v1565_v16 = vadd.f32 %v1562_v12, %v1553_v15  ;;  %v1577_v15 = vld [vmem:[%s4544_s9] sm:$0xf] }
 0x298   : > { %v1566_v18 = vmax.f32 %v1564_v14, 0.0 }
 0x299   : > { %v1567_v19 = vmax.f32 %v1565_v16, 0.0 }
 0x29b   : > { %v4167_v20 = vcombine.low %v1566_v18, %v1567_v19  ;;  %v3760_v26 = vcombine.low %v1567_v19, %v1567_v19 }
 0x29d   : > { %1572 = vst [vmem:[#allocation2 + $0x4] sm:$0xff] %v4167_v20  ;;  %v2039_v43 = vmul.f32 %v4167_v20, %v4034_v52  ;;  %v2136_v45 = vmul.f32 %v4167_v20, %v4039_v55  ;;  %v2328_v54 = vmul.f32 %v4167_v20, %v4058_v3 }
 0x29f   : > { %v2045_v46 = vcombine.high %v2039_v43, %v2039_v43  ;;  %v2142_v47 = vcombine.high %v2136_v45, %v2136_v45  ;;  %v2334_v56 = vcombine.high %v2328_v54, %v2328_v54 }
 0x2a4   : > { %v1574_v21 = vld [vmem:[#allocation2 + $0x8] sm:$0xf]  ;;  %v1573_v22 = vld [vmem:[#allocation2] sm:$0xff] }
 0x2a5   : > { %1587 = vrot.lane.b32.xlu1 %v1574_v21, %s4561_s21  ;;  %v1582_v23 = vcombine.high %v1573_v22, %v1573_v22  ;;  %v1575_v24 = vmul.f32 %v1573_v22, %v4000_v30  ;;  %v1759_v27 = vld [vmem:[#allocation2 + $0x8] sm:$0xf]  ;;  %v1576_v29 = vmul.f32 %v1574_v21, %v3996_v28  ;;  %v1760_v31 = vmul.f32 %v1573_v22, %v4012_v39 }
 0x2a6   : > { %v1761_v32 = vmul.f32 %v1759_v27, %v4004_v35  ;;  %v1857_v33 = vmul.f32 %v1573_v22, %v4017_v40  ;;  %v1856_v37 = vld [vmem:[#allocation2 + $0x8] sm:$0xf]  ;;  %v3556_v27 = vld [vmem:[%s4544_s9 + $0xc] sm:$0xf] }
 0x2a7   : > { %1585 = vrot.lane.b32.xlu0 %v1582_v23, %s4561_s21  ;;  %v1671_v25 = vcombine.high %v1575_v24, %v1575_v24  ;;  %v1766_v34 = vcombine.high %v1760_v31, %v1760_v31  ;;  %v1858_v42 = vmul.f32 %v1856_v37, %v4007_v38 }
 0x2a8   : > { %v1863_v36 = vcombine.high %v1857_v33, %v1857_v33 }
 0x2a9   : > { %1674 = vrot.lane.b32.xlu1 %v1671_v25, %s3833_s20 }
 0x2ab   : > { %1583 = vrot.lane.b32.xlu0 %v1573_v22, %s4561_s21  ;;  %v3552_v22 = vld [vmem:[%s4544_s9 + $0x8] sm:$0xf] }
 0x2ad   : > { %1672 = vrot.lane.b32.xlu1 %v1575_v24, %s3833_s20 }
 0x2af   : > { %1676 = vrot.lane.b32.xlu0 %v1576_v29, %s3833_s20 }
 0x2b1   : > { %1771 = vrot.lane.b32.xlu1 %v1761_v32, %s4559_s16 }
 0x2b3   : > { %1769 = vrot.lane.b32.xlu0 %v1766_v34, %s4559_s16 }
 0x2b5   : > { %1866 = vrot.lane.b32.xlu1 %v1863_v36, %s4555_s15  ;;  %v3560_v36 = vld [vmem:[%s4544_s9 + $0x10] sm:$0xf] }
 0x2b7   : > { %1767 = vrot.lane.b32.xlu0 %v1760_v31, %s4559_s16  ;;  %s3638_s16 = sshll.u32 %s3929_s29, 9 }
 0x2b9   : > { %1864 = vrot.lane.b32.xlu1 %v1857_v33, %s4555_s15 }
 0x2bb   : > { %1868 = vrot.lane.b32.xlu0 %v1858_v42, %s4555_s15  ;;  %s4573_s15 = smov 15  }
 0x2bd   : > { %2050 = vrot.lane.b32.xlu1 %v2040_v44, %s4570_s24 }
 0x2bf   : > { %2048 = vrot.lane.b32.xlu0 %v2045_v46, %s4570_s24 }
 0x2c1   : > { %2145 = vrot.lane.b32.xlu1 %v2142_v47, %s4571_s30 }
 0x2c3   : > { %2046 = vrot.lane.b32.xlu0 %v2039_v43, %s4570_s24  ;;  %v3564_v43 = vld [vmem:[%s4544_s9 + $0x14] sm:$0xf] }
 0x2c5   : > { %2143 = vrot.lane.b32.xlu1 %v2136_v45, %s4571_s30 }
 0x2c7   : > { %2147 = vrot.lane.b32.xlu0 %v2137_v50, %s4571_s30 }
 0x2c9   : > { %2242 = vrot.lane.b32.xlu1 %v2232_v53, %s4572_s22 }
 0x2cb   : > { %2240 = vrot.lane.b32.xlu0 %v3760_v26, %s4572_s22 }
 0x2cd   : > { %2337 = vrot.lane.b32.xlu1 %v2334_v56, %s4557_s6 }
 0x2cf   : > { %2238 = vrot.lane.b32.xlu0 %v4167_v20, %s4572_s22 }
 0x2d1   : > { %2335 = vrot.lane.b32.xlu1 %v2328_v54, %s4557_s6 }
 0x2d3   : > { %2339 = vrot.lane.b32.xlu0 %v2329_v58, %s4557_s6  ;;  %s4575_s6 = smov 111  }
 0x2d7   : > { %2426 = vperm.xlu0 %3753, %v2423_v59   ;;  %v3576_v59 = vld [vmem:[%s4544_s9 + $0x20] sm:$0xf] }
 0x2db   : > { %2972 = vrot.lane.b32.xlu0 %v2961_v61, %s4570_s24  ;;  %v4304_v61 = vpop.f32.mrb[1].mxu0 }
 0x2dc   : > { %v4306_v62 = vpop.f32.mrb[2].mxu0 }
 0x2df   : > { %3081 = vrot.lane.b32.xlu0 %v3070_v0, %s4571_s30  ;;  %v4308_v0 = vpop.f32.mrb[3].mxu0 }
 0x317   : > { %v1588_v2 = vpop.permute.xlu1 %1587 }
 0x319   : > { %v1586_v4 = vpop.permute.xlu0 %1585 }
 0x31a   : > { %v1590_v5 = vsel %vm677_vm8, %v1586_v4, %v1588_v2  ;;  %v3177_v2 = vld [vmem:[#allocation2 + $0xc] sm:$0xf] }
 0x31b   : > { %v1675_v6 = vpop.permute.xlu1 %1674  ;;  %3546 = vmatprep.subr.msk.mxu0 %vm467_vm0, %v1590_v5  ;;  %3188 = vrot.lane.b32.xlu0 %v3177_v2, %s4572_s22 }
 0x31d   : > { %v1584_v7 = vpop.permute.xlu0 %1583 }
 0x31e   : > { %v1589_v49 = vsel %vm677_vm8, %v1584_v7, %v1586_v4 }
 0x31f   : > { %v1673_v10 = vpop.permute.xlu1 %1672  ;;  %3547 = vmatpush1.msk.msra.mxu0 %vm467_vm0, %v1589_v49 }
 0x320   : > { %3548 = vmatmul.mubr.msk.f32.vlgmr.msra.gmra.mrb[4].mxu0 %vm460_vm1, %v3545_v8  ;;  %v1678_v12 = vsel %vm767_vm7, %v1673_v10, %v1675_v6 }
 0x321   : > { %v1677_v51 = vpop.permute.xlu0 %1676  ;;  %1751 = vmatprep.mubr.f32.mxu0 %v3826_v1 }
 0x322   : > { %v1679_v11 = vsel %vm767_vm7, %v1675_v6, %v1677_v51 }
 0x323   : > { %v1772_v13 = vpop.permute.xlu1 %1771  ;;  %3549 = vmatprep.subr.msk.mxu0 %vm467_vm0, %v1679_v11 }
 0x324   : > { %3550 = vmatpush1.msk.msra.mxu0 %vm467_vm0, %v1678_v12  ;;  %v3602_v12 = vld [vmem:[%s4546_s11 + $0x40] sm:$0xff] }
 0x325   : > { %v1770_v14 = vpop.permute.xlu0 %1769 }
 0x326   : > { %v1774_v16 = vsel %vm880_vm6, %v1770_v14, %v1772_v13 }
 0x327   : > { %v1867_v17 = vpop.permute.xlu1 %1866  ;;  %3553 = vmatprep.subr.msk.mxu0 %vm467_vm0, %v1774_v16 }
 0x328   : > { %3551 = vmatmul.mubr.msk.f32.vlgmr.msra.gmra.mrb[4].mxu0 %vm460_vm1, %v1577_v15  ;;  %v3603_v15 = vld [vmem:[%s4546_s11 + $0x48] sm:$0xff] }
 0x329   : > { %v1768_v18 = vpop.permute.xlu0 %1767  ;;  %1846 = vmatprep.mubr.f32.mxu0 %v3826_v1 }
 0x32a   : > { %v1773_v19 = vsel %vm880_vm6, %v1768_v18, %v1770_v14 }
 0x32b   : > { %3554 = vmatpush1.msk.msra.mxu0 %vm467_vm0, %v1773_v19  ;;  %v1865_v9 = vpop.permute.xlu1 %1864 }
 0x32c   : > { %v1870_v24 = vsel %vm985_vm5, %v1865_v9, %v1867_v17 }
 0x32d   : > { %v1869_v21 = vpop.permute.xlu0 %1868 }
 0x32e   : > { %v1871_v23 = vsel %vm985_vm5, %v1867_v17, %v1869_v21 }
 0x32f   : > { %3557 = vmatprep.subr.msk.mxu0 %vm467_vm0, %v1871_v23  ;;  %v2051_v29 = vpop.permute.xlu1 %2050 }
 0x330   : > { %3555 = vmatmul.mubr.msk.f32.vlgmr.msra.gmra.mrb[4].mxu0 %vm460_vm1, %v3552_v22 }
 0x331   : > { %3558 = vmatpush1.msk.msra.mxu0 %vm467_vm0, %v1870_v24  ;;  %v2049_v25 = vpop.permute.xlu0 %2048  ;;  %1943 = vmatprep.mubr.f32.mxu0 %v3826_v1  ;;  %v3284_v24 = vld [vmem:[#allocation2 + $0xc] sm:$0xf] }
 0x332   : > { %3561 = vmatprep.subr.msk.mxu0 %vm467_vm0, %v3760_v26  ;;  %v2053_v32 = vsel %vm968_vm4, %v2049_v25, %v2051_v29 }
 0x333   : > { %v2146_v33 = vpop.permute.xlu1 %2145 }
 0x335   : > { %v2047_v31 = vpop.permute.xlu0 %2046 }
 0x336   : > { %v2052_v37 = vsel %vm968_vm4, %v2047_v31, %v2049_v25 }
 0x338   : > { %3559 = vmatmul.mubr.msk.f32.vlgmr.msra.gmra.mrb[4].mxu0 %vm460_vm1, %v3556_v27 }
 0x339   : > { %3562 = vmatpush1.msk.msra.mxu0 %vm467_vm0, %v4167_v20  ;;  %2028 = vmatprep.mubr.f32.mxu0 %v3826_v1  ;;  %v2148_v34 = vpop.permute.xlu0 %2147  ;;  %v2144_v20 = vpop.permute.xlu1 %2143 }
 0x33a   : > { %3565 = vmatprep.subr.msk.mxu0 %vm467_vm0, %v2053_v32  ;;  %v2150_v41 = vsel %vm863_vm3, %v2146_v33, %v2148_v34  ;;  %v2149_v44 = vsel %vm863_vm3, %v2144_v20, %v2146_v33  ;;  %v446_v32 = vld [vmem:[%s4539_s4] sm:$0xff] }
 0x33d   : > { %v2241_v42 = vpop.permute.xlu0 %2240  ;;  %v2243_v45 = vpop.permute.xlu1 %2242 }
 0x33e   : > { %v2245_v47 = vsel %vm1372_vm9, %v2241_v42, %v2243_v45  ;;  %v3580_v45 = vld [vmem:[%s4546_s11 + $0x10] sm:$0xff] }
 0x340   : > { %3563 = vmatmul.mubr.msk.f32.vlgmr.msra.gmra.mrb[4].mxu0 %vm460_vm1, %v3560_v36 }
 0x341   : > { %3566 = vmatpush1.msk.msra.mxu0 %vm467_vm0, %v2052_v37  ;;  %2125 = vmatprep.mubr.f32.mxu0 %v3826_v1  ;;  %v2239_v46 = vpop.permute.xlu0 %2238  ;;  %v2338_v53 = vpop.permute.xlu1 %2337 }
 0x342   : > { %3569 = vmatprep.subr.msk.mxu0 %vm467_vm0, %v2150_v41  ;;  %v2244_v54 = vsel %vm1372_vm9, %v2239_v46, %v2241_v42 }
 0x345   : > { %v2340_v50 = vpop.permute.xlu0 %2339  ;;  %v2336_v56 = vpop.permute.xlu1 %2335 }
 0x346   : > { %v2342_v26 = vsel %vm659_vm2, %v2338_v53, %v2340_v50  ;;  %v2341_v58 = vsel %vm659_vm2, %v2336_v56, %v2338_v53 }
 0x348   : > { %3567 = vmatmul.mubr.msk.f32.vlgmr.msra.gmra.mrb[4].mxu0 %vm460_vm1, %v3564_v43 }
 0x349   : > { %3570 = vmatpush1.msk.msra.mxu0 %vm467_vm0, %v2149_v44  ;;  %2222 = vmatprep.mubr.f32.mxu0 %v3826_v1 }
 0x34a   : > { %3573 = vmatprep.subr.msk.mxu0 %vm467_vm0, %v2245_v47 }
 0x350   : > { %3571 = vmatmul.mubr.msk.f32.vlgmr.msra.gmra.mrb[4].mxu0 %vm460_vm1, %v3568_v48  ;;  %v3581_v48 = vld [vmem:[%s4546_s11 + $0x18] sm:$0xff] }
 0x351   : > { %3574 = vmatpush1.msk.msra.mxu0 %vm467_vm0, %v2244_v54  ;;  %2317 = vmatprep.mubr.f32.mxu0 %v3826_v1 }
 0x352   : > { %3577 = vmatprep.subr.msk.mxu0 %vm467_vm0, %v2342_v26 }
 0x356   : > { %v2427_v4 = vpop.permute.xlu0 %2426 }
 0x358   : > { %3575 = vmatmul.mubr.msk.f32.vlgmr.msra.gmra.mrb[4].mxu0 %vm460_vm1, %v3572_v57 }
 0x359   : > { %3578 = vmatpush1.msk.msra.mxu0 %vm467_vm0, %v2341_v58  ;;  %2414 = vmatprep.mubr.f32.mxu0 %v3826_v1  ;;  %v3608_v58 = vld [vmem:[%s4546_s11 + $0x50] sm:$0xff] }
 0x35a   : > { %v2973_v33 = vpop.permute.xlu0 %2972 }
 0x35e   : > { %v3082_v34 = vpop.permute.xlu0 %3081 }
 0x360   : > { %3579 = vmatmul.mubr.msk.f32.vlgmr.msra.gmra.mrb[4].mxu0 %vm460_vm1, %v3576_v59 }
 0x361   : > { %2532 = vmatprep.mubr.f32.mxu0 %v3826_v1 }
 0x38d   : > { %v3189_v36 = vpop.permute.xlu0 %3188 }
 0x433   : > { %v2416_v5 = vpop.f32.mrb[4].mxu0 }
 0x434   : > { %v2429_v6 = vadd.f32 %v2427_v4, %v2416_v5  ;;  %v2418_v7 = vpop.f32.mrb[5].mxu0  ;;  %v3609_v5 = vld [vmem:[%s4546_s11 + $0x58] sm:$0xff] }
 0x435   : > { %v2430_v8 = vadd.f32 %v2427_v4, %v2418_v7 }
 0x436   : > { %v2431_v49 = vmax.f32 %v2429_v6, 0.0  ;;  %v2442_v6 = vld [vmem:[%s4546_s11] sm:$0xff] }
 0x437   : > { %v2432_v10 = vmax.f32 %v2430_v8, 0.0 }
 0x439   : > { %v2435_v51 = vcombine.low %v2431_v49, %v2432_v10  ;;  %v3761_v11 = vcombine.low %v2432_v10, %v2432_v10 }
 0x43b   : > { %2437 = vst [vmem:[#allocation2 + $0x4] sm:$0xff] %v2435_v51  ;;  %3604 = vmatprep.subr.msk.mxu1 %vm467_vm0, %v3761_v11  ;;  %v2960_v16 = vmul.f32 %v2435_v51, %v4034_v52  ;;  %v3069_v9 = vmul.f32 %v2435_v51, %v4039_v55  ;;  %v3285_v27 = vmul.f32 %v2435_v51, %v4058_v3 }
 0x43c   : > { %3605 = vmatpush1.msk.msra.mxu1 %vm467_vm0, %v2435_v51 }
 0x43d   : > { %3606 = vmatmul.mubr.msk.f32.vlgmr.msra.gmra.mrb[4].mxu1 %vm460_vm1, %v3602_v12  ;;  %v2967_v22 = vcombine.high %v2960_v16, %v2960_v16  ;;  %v3076_v23 = vcombine.high %v3069_v9, %v3069_v9  ;;  %v3292_v3 = vcombine.high %v3285_v27, %v3285_v27  ;;  %v2443_v12 = vld [vmem:[%s4546_s11 + $0x8] sm:$0xff] }
 0x43e   : > { %2947 = vmatprep.mubr.f32.mxu1 %v3826_v1 }
 0x441   : > { %3607 = vmatmul.mubr.msk.f32.gmra.mrb[6].mxu1 %vm460_vm1, %v3603_v15 }
 0x442   : > { %v2439_v13 = vld [vmem:[#allocation2 + $0x8] sm:$0xf]  ;;  %v2438_v14 = vld [vmem:[#allocation2] sm:$0xff]  ;;  %3050 = vmatprep.mubr.f32.mxu1 %v3826_v1 }
 0x443   : > { %2454 = vrot.lane.b32.xlu0 %v2439_v13, %s4561_s21  ;;  %2450 = vrot.lane.b32.xlu1 %v2438_v14, %s4561_s21  ;;  %v2449_v17 = vcombine.high %v2438_v14, %v2438_v14  ;;  %v2441_v18 = vmul.f32 %v2439_v13, %v3996_v28  ;;  %v2440_v19 = vmul.f32 %v2438_v14, %v4000_v30  ;;  %v2644_v21 = vld [vmem:[#allocation2 + $0x8] sm:$0xf] }
 0x444   : > { %v2646_v52 = vmul.f32 %v2644_v21, %v4004_v35  ;;  %v2753_v30 = vld [vmem:[#allocation2 + $0x8] sm:$0xf]  ;;  %v3286_v35 = vmul.f32 %v3284_v24, %v4051_v63  ;;  %v2645_v25 = vmul.f32 %v2438_v14, %v4012_v39  ;;  %v2754_v31 = vmul.f32 %v2438_v14, %v4017_v40  ;;  %v3392_v40 = vld [vmem:[%s4547_s12] sm:$0xff] }
 0x445   : > { %v2547_v28 = vcombine.high %v2440_v19, %v2440_v19  ;;  %v2755_v55 = vmul.f32 %v2753_v30, %v4007_v38  ;;  %v3393_v38 = vld [vmem:[%s4547_s12 + $0x8] sm:$0xff]  ;;  %v3590_v21 = vld [vmem:[%s4546_s11 + $0x20] sm:$0xff]  ;;  %v3621_v30 = vld [vmem:[%s4546_s11 + $0x78] sm:$0xff] }
 0x446   : > { %v2652_v29 = vcombine.high %v2645_v25, %v2645_v25  ;;  %v2761_v63 = vcombine.high %v2754_v31, %v2754_v31  ;;  %v447_v39 = vld [vmem:[%s4539_s4 + $0x8] sm:$0xff] }
 0x447   : > { %2968 = vrot.lane.b32.xlu0 %v2960_v16, %s4570_s24  ;;  %2452 = vrot.lane.b32.xlu1 %v2449_v17, %s4561_s21  ;;  %v3615_v16 = vld [vmem:[%s4546_s11 + $0x68] sm:$0xff]  ;;  %s3836_s21 = smov [#allocation3]  }
 0x448   : > { %s3766_s0 = sshll.u32 %s3836_s21, 4  ;;  %s3767_s0 = int_to_ptr.vmem [resolvable:$false] %s3766_s0 }
 0x449   : > { %s3768_s1 = scalar_lea.vmem %s3767_s0, 1024 }
 0x44b   : > { %2552 = vrot.lane.b32.xlu0 %v2441_v18, %s3833_s20  ;;  %2548 = vrot.lane.b32.xlu1 %v2440_v19, %s3833_s20 }
 0x44f   : > { %3077 = vrot.lane.b32.xlu0 %v3069_v9, %s4571_s30  ;;  %3186 = vrot.lane.b32.xlu1 %v3761_v11, %s4572_s22  ;;  %v3620_v9 = vld [vmem:[%s4546_s11 + $0x70] sm:$0xff] }
 0x453   : > { %2657 = vrot.lane.b32.xlu0 %v2646_v52, %s4573_s15  ;;  %2970 = vrot.lane.b32.xlu1 %v2967_v22, %s4570_s24  ;;  %s4489_s24 = scalar_lea.hbm %s4548_s13, %s3638_s16 }
 0x457   : > { %3184 = vrot.lane.b32.xlu0 %v2435_v51, %s4572_s22  ;;  %2550 = vrot.lane.b32.xlu1 %v2547_v28, %s3833_s20  ;;  %v3614_v51 = vld [vmem:[%s4546_s11 + $0x60] sm:$0xff] }
 0x45b   : > { %2766 = vrot.lane.b32.xlu0 %v2755_v55, %s4574_s23  ;;  %3079 = vrot.lane.b32.xlu1 %v3076_v23, %s4571_s30  ;;  %v3591_v55 = vld [vmem:[%s4546_s11 + $0x28] sm:$0xff] }
 0x45f   : > { %3297 = vrot.lane.b32.xlu0 %v3286_v35, %s4575_s6  ;;  %2653 = vrot.lane.b32.xlu1 %v2645_v25, %s4573_s15 }
 0x463   : > { %3293 = vrot.lane.b32.xlu0 %v3285_v27, %s4575_s6  ;;  %2655 = vrot.lane.b32.xlu1 %v2652_v29, %s4573_s15  ;;  %v3626_v27 = vld [vmem:[%s4546_s11 + $0x80] sm:$0xff] }
 0x467   : > { %3401 = vperm.xlu0 %3753, %v3393_v38   ;;  %2764 = vrot.lane.b32.xlu1 %v2761_v63, %s4574_s23  ;;  %v3627_v63 = vld [vmem:[%s4546_s11 + $0x88] sm:$0xff] }
 0x46b   : > { %455 = vperm.xlu0 %3753, %v447_v39   ;;  %3295 = vrot.lane.b32.xlu1 %v3292_v3, %s4575_s6  ;;  %v3597_v39 = vld [vmem:[%s4546_s11 + $0x38] sm:$0xff] }
 0x46f   : > { %2762 = vrot.lane.b32.xlu1 %v2754_v31, %s4574_s23  ;;  %v3596_v31 = vld [vmem:[%s4546_s11 + $0x30] sm:$0xff]  ;;  %s431_s23 = sand.u32 1, %s3816_s26  }
 0x470   : > { %s3500_s6 = sshll.u32 %s431_s23, 5  ;;  %s4493_s29 = scalar_lea.sflag [#allocation4], %s431_s23 }
 0x471   : > { %s433_s30 = scalar_lea.vmem [#allocation3], %s3500_s6 }
 0x472   : > { %s3434_s22 = sshll.u32 %s433_s30, 4  ;;  %s4484_s22 = int_to_ptr.vmem [resolvable:$true] %s3434_s22 }
 0x473   : > { %3396 = vperm.xlu1 %3754, %v3392_v40   ;;  %s3762_s6 = scalar_lea.vmem %s4484_s22, 512  ;;  %p3769_p0 = scmp.lt.s32.totalorder %s4484_s22, %s3767_s0 }
 0x474   : > { %p3763_p11 = scmp.ne.s32.totalorder %s4484_s22, %s3762_s6  ;;  %p3770_p1 = scmp.lt.s32.totalorder %s3768_s1, %s3762_s6 }
 0x476   : > { %p3764_p12 = pnand %p3763_p11, %p3946_p5  ;;  %p3771_p2 = por %p3770_p1, %p3769_p0 }
 0x477   : > { %450 = vperm.xlu1 %3754, %v446_v32  }
 0x478   : > { %p3765_p13 = pneg %p3764_p12 }
 0x47a   : > { %p3772_p3 = pnand %p3771_p2, %p3765_p13 }
 0x4b5   : > { %v2455_v37 = vpop.permute.xlu0 %2454  ;;  %v2451_v41 = vpop.permute.xlu1 %2450 }
 0x4b9   : > { %v2969_v20 = vpop.permute.xlu0 %2968  ;;  %v2453_v42 = vpop.permute.xlu1 %2452 }
 0x4ba   : > { %v2456_v43 = vsel %vm677_vm8, %v2451_v41, %v2453_v42  ;;  %v2457_v44 = vsel %vm677_vm8, %v2453_v42, %v2455_v37 }
 0x4bb   : > { %3582 = vmatprep.subr.msk.mxu0 %vm467_vm0, %v2457_v44 }
 0x4bc   : > { %3583 = vmatpush1.msk.msra.mxu0 %vm467_vm0, %v2456_v43 }
 0x4bd   : > { %v2553_v46 = vpop.permute.xlu0 %2552  ;;  %v2549_v47 = vpop.permute.xlu1 %2548  ;;  %3584 = vmatmul.mubr.msk.f32.vlgmr.msra.gmra.mrb[6].mxu0 %vm460_vm1, %v3580_v45 }
 0x4be   : > { %2538 = vmatprep.mubr.f32.mxu0 %v3826_v1 }
 0x4c1   : > { %v3078_v50 = vpop.permute.xlu0 %3077  ;;  %v3187_v53 = vpop.permute.xlu1 %3186  ;;  %3585 = vmatmul.mubr.msk.f32.gmra.mrb[8].mxu0 %vm460_vm1, %v3581_v48 }
 0x4c2   : > { %2630 = vmatprep.mubr.f32.mxu0 %v3826_v1  ;;  %v3191_v11 = vsel %vm1372_vm9, %v3187_v53, %v3189_v36 }
 0x4c5   : > { %v2658_v54 = vpop.permute.xlu0 %2657  ;;  %v2971_v26 = vpop.permute.xlu1 %2970 }
 0x4c6   : > { %v2974_v56 = vsel %vm968_vm4, %v2969_v20, %v2971_v26  ;;  %v2975_v57 = vsel %vm968_vm4, %v2971_v26, %v2973_v33 }
 0x4c7   : > { %3610 = vmatprep.subr.msk.mxu1 %vm467_vm0, %v2975_v57 }
 0x4c8   : > { %3611 = vmatpush1.msk.msra.mxu1 %vm467_vm0, %v2974_v56 }
 0x4c9   : > { %3612 = vmatmul.mubr.msk.f32.vlgmr.msra.gmra.mrb[4].mxu1 %vm460_vm1, %v3608_v58  ;;  %v2551_v59 = vpop.permute.xlu1 %2550  ;;  %v3185_v7 = vpop.permute.xlu0 %3184 }
 0x4ca   : > { %v2554_v2 = vsel %vm767_vm7, %v2549_v47, %v2551_v59  ;;  %v2555_v4 = vsel %vm767_vm7, %v2551_v59, %v2553_v46  ;;  %3056 = vmatprep.mubr.f32.mxu1 %v3826_v1  ;;  %v3190_v13 = vsel %vm1372_vm9, %v3185_v7, %v3187_v53 }
 0x4cb   : > { %3586 = vmatprep.subr.msk.mxu0 %vm467_vm0, %v2555_v4 }
 0x4cc   : > { %3587 = vmatpush1.msk.msra.mxu0 %vm467_vm0, %v2554_v2 }
 0x4cd   : > { %3613 = vmatmul.mubr.msk.f32.gmra.mrb[6].mxu1 %vm460_vm1, %v3609_v5  ;;  %v3080_v8 = vpop.permute.xlu1 %3079  ;;  %3588 = vmatmul.mubr.msk.f32.vlgmr.msra.gmra.mrb[6].mxu0 %vm460_vm1, %v2442_v6  ;;  %v2767_v14 = vpop.permute.xlu0 %2766 }
 0x4ce   : > { %v3083_v49 = vsel %vm863_vm3, %v3078_v50, %v3080_v8  ;;  %v3084_v10 = vsel %vm863_vm3, %v3080_v8, %v3082_v34  ;;  %3159 = vmatprep.mubr.f32.mxu1 %v3826_v1  ;;  %2636 = vmatprep.mubr.f32.mxu0 %v3826_v1 }
 0x4cf   : > { %3616 = vmatprep.subr.msk.mxu1 %vm467_vm0, %v3084_v10 }
 0x4d0   : > { %3617 = vmatpush1.msk.msra.mxu1 %vm467_vm0, %v3083_v49 }
 0x4d1   : > { %3618 = vmatmul.mubr.msk.f32.vlgmr.msra.gmra.mrb[4].mxu1 %vm460_vm1, %v3614_v51  ;;  %3622 = vmatprep.subr.msk.mxu1 %vm467_vm0, %v3191_v11  ;;  %v2654_v15 = vpop.permute.xlu1 %2653  ;;  %v3298_v52 = vpop.permute.xlu0 %3297 }
 0x4d2   : > { %3623 = vmatpush1.msk.msra.mxu1 %vm467_vm0, %v3190_v13  ;;  %3165 = vmatprep.mubr.f32.mxu1 %v3826_v1 }
 0x4d3   : > { %3589 = vmatmul.mubr.msk.f32.gmra.mrb[8].mxu0 %vm460_vm1, %v2443_v12 }
 0x4d4   : > { %2735 = vmatprep.mubr.f32.mxu0 %v3826_v1 }
 0x4d5   : > { %3619 = vmatmul.mubr.msk.f32.gmra.mrb[6].mxu1 %vm460_vm1, %v3615_v16  ;;  %v2656_v17 = vpop.permute.xlu1 %2655  ;;  %v3294_v23 = vpop.permute.xlu0 %3293 }
 0x4d6   : > { %v2659_v18 = vsel %vm880_vm6, %v2654_v15, %v2656_v17  ;;  %v2660_v19 = vsel %vm880_vm6, %v2656_v17, %v2658_v54  ;;  %3266 = vmatprep.mubr.f32.mxu1 %v3826_v1 }
 0x4d7   : > { %3592 = vmatprep.subr.msk.mxu0 %vm467_vm0, %v2660_v19 }
 0x4d8   : > { %3593 = vmatpush1.msk.msra.mxu0 %vm467_vm0, %v2659_v18 }
 0x4d9   : > { %3624 = vmatmul.mubr.msk.f32.vlgmr.msra.gmra.mrb[4].mxu1 %vm460_vm1, %v3620_v9  ;;  %v2765_v22 = vpop.permute.xlu1 %2764  ;;  %3594 = vmatmul.mubr.msk.f32.vlgmr.msra.gmra.mrb[6].mxu0 %vm460_vm1, %v3590_v21 }
 0x4da   : > { %v2769_v28 = vsel %vm985_vm5, %v2765_v22, %v2767_v14  ;;  %3272 = vmatprep.mubr.f32.mxu1 %v3826_v1  ;;  %2741 = vmatprep.mubr.f32.mxu0 %v3826_v1 }
 0x4db   : > { %3598 = vmatprep.subr.msk.mxu0 %vm467_vm0, %v2769_v28 }
 0x4dd   : > { %3625 = vmatmul.mubr.msk.f32.gmra.mrb[6].mxu1 %vm460_vm1, %v3621_v30  ;;  %v3296_v24 = vpop.permute.xlu1 %3295  ;;  %3595 = vmatmul.mubr.msk.f32.gmra.mrb[8].mxu0 %vm460_vm1, %v3591_v55 }
 0x4de   : > { %v3299_v35 = vsel %vm659_vm2, %v3294_v23, %v3296_v24  ;;  %v3300_v25 = vsel %vm659_vm2, %v3296_v24, %v3298_v52  ;;  %3375 = vmatprep.mubr.f32.mxu1 %v3826_v1  ;;  %2844 = vmatprep.mubr.f32.mxu0 %v3826_v1 }
 0x4df   : > { %3628 = vmatprep.subr.msk.mxu1 %vm467_vm0, %v3300_v25 }
 0x4e0   : > { %3629 = vmatpush1.msk.msra.mxu1 %vm467_vm0, %v3299_v35 }
 0x4e1   : > { %3630 = vmatmul.mubr.msk.f32.vlgmr.msra.gmra.mrb[4].mxu1 %vm460_vm1, %v3626_v27  ;;  %v2763_v29 = vpop.permute.xlu1 %2762 }
 0x4e2   : > { %v2768_v38 = vsel %vm985_vm5, %v2763_v29, %v2765_v22  ;;  %3381 = vmatprep.mubr.f32.mxu1 %v3826_v1 }
 0x4e3   : > { %3599 = vmatpush1.msk.msra.mxu0 %vm467_vm0, %v2768_v38 }
 0x4e4   : > { %3600 = vmatmul.mubr.msk.f32.vlgmr.msra.gmra.mrb[6].mxu0 %vm460_vm1, %v3596_v31 }
 0x4e5   : > { %3631 = vmatmul.mubr.msk.f32.gmra.mrb[6].mxu1 %vm460_vm1, %v3627_v63  ;;  %2850 = vmatprep.mubr.f32.mxu0 %v3826_v1 }
 0x4e6   : > { %v3402_v33 = vpop.permute.xlu0 %3401 }
 0x4e8   : > { %3601 = vmatmul.mubr.msk.f32.gmra.mrb[8].mxu0 %vm460_vm1, %v3597_v39 }
 0x4ea   : > { %v456_v53 = vpop.permute.xlu0 %455 }
 0x4eb   : > { %v545_v4 = vadd.f32 %v4306_v62, %v456_v53  ;;  %v547_v5 = vadd.f32 %v4308_v0, %v456_v53 }
 0x4f2   : > { %v3397_v3 = vpop.permute.xlu1 %3396 }
 0x4f6   : > { %v451_v20 = vpop.permute.xlu1 %450 }
 0x4f7   : > { %v539_v46 = vadd.f32 %v4302_v60, %v451_v20  ;;  %v541_v54 = vadd.f32 %v4304_v61, %v451_v20 }
 0x5b4   : > { %v3377_v40 = vpop.f32.mrb[4].mxu1 }
 0x5b5   : > { %v3379_v32 = vpop.f32.mrb[5].mxu1 }
 0x5b7   : > { %v2846_v34 = vpop.f32.mrb[6].mxu0 }
 0x5b8   : > { %v3639_v36 = vadd.f32 %v3377_v40, %v2846_v34  ;;  %v2848_v37 = vpop.f32.mrb[7].mxu0  ;;  %v3383_v41 = vpop.f32.mrb[6].mxu1 }
 0x5b9   : > { %v3640_v42 = vadd.f32 %v3379_v32, %v2848_v37  ;;  %v3385_v43 = vpop.f32.mrb[7].mxu1 }
 0x5ba   : > { %v3404_v1 = vadd.f32 %v3639_v36, %v3397_v3 }
 0x5bb   : > { %v3405_v44 = vadd.f32 %v3640_v42, %v3397_v3  ;;  %v2852_v45 = vpop.f32.mrb[8].mxu0 }
 0x5bc   : > { %v3408_v47 = vmul.f32 0.25, %v3404_v1  ;;  %v3641_v48 = vadd.f32 %v3383_v41, %v2852_v45  ;;  %v2854_v50 = vpop.f32.mrb[9].mxu0 }
 0x5bd   : > { %v3409_v26 = vmul.f32 0.25, %v3405_v44  ;;  %v3642_v56 = vadd.f32 %v3385_v43, %v2854_v50 }
 0x5be   : > { %v3412_v57 = vadd.f32 %v3408_v47, %v539_v46  ;;  %v3406_v58 = vadd.f32 %v3641_v48, %v3402_v33 }
 0x5bf   : > { %v3413_v59 = vadd.f32 %v3409_v26, %v541_v54  ;;  %v3407_v2 = vadd.f32 %v3642_v56, %v3402_v33 }
 0x5c0   : > { %3416 = vst [vmem:[%s433_s30] sm:$0xff] %v3412_v57  ;;  %v3410_v60 = vmul.f32 0.25, %v3406_v58 }
 0x5c1   : > { %3417 = vst [vmem:[%s433_s30 + $0x8] sm:$0xff] %v3413_v59  ;;  %v3411_v6 = vmul.f32 0.25, %v3407_v2 }
 0x5c2   : > { %v3414_v61 = vadd.f32 %v3410_v60, %v545_v4 }
 0x5c3   : > { %v3415_v7 = vadd.f32 %v3411_v6, %v547_v5 }
 0x5c4   : > { %3418 = vst [vmem:[%s433_s30 + $0x10] sm:$0xff] %v3414_v61 }
 0x5c5   : > { %3419 = vst [vmem:[%s433_s30 + $0x18] sm:$0xff] %v3415_v7 }
 0x5c6   : > { %3775 = shalt.err (!%p3772_p3)
}
 0x5c7   : > { %s3776_s23 = scalar_lea.hbm %s4489_s24, 512  ;;  %s3780_s21 = scalar_lea.hbm %s4548_s13, 1024 }
 0x5c8   : > { %p3777_p4 = scmp.ne.s32.totalorder %s4489_s24, %s3776_s23  ;;  %p3781_p9 = scmp.lt.u32.totalorder %s4489_s24, %s4548_s13 }
 0x5c9   : > { %p3782_p10 = scmp.lt.u32.totalorder %s3780_s21, %s3776_s23  ;;  %p3784_p12 = scmp.lt.u32.totalorder %s3776_s23, %s4489_s24 }
 0x5ca   : > { %p3778_p7 = pnand %p3777_p4, %p3946_p5 }
 0x5cb   : > { %p3783_p11 = por %p3782_p10, %p3781_p9 }
 0x5cc   : > { %p3779_p8 = pneg %p3778_p7 }
 0x5cd   : > { %p3785_p13 = por %p3784_p12, %p3783_p11 }
 0x5cf   : > { %p3786_p0 = pnand %p3785_p13, %p3779_p8 }
 0x5d1   : > { %3789 = shalt.err (!%p3786_p0)
}
 0x5d2   : > { %s3837_s1 = smov 256   ;;  %s4576_s20 = smov 16  }
 0x5d3   : > { %3703 = dma.vmem_to_hbm [thread:$0]  (%p3946_p5), %s4484_s22, 512, %s4489_s24, %s4493_s29, %s3837_s1, %s3837_s1, %s4576_s20  }
 0x5d4 PF: > { %p3709_p1 = scmp.ge.s32.totalorder %s3824_s28, 2  ;;  %s3449_s6 = sand.u32 1, %s3812_s25  }
 0x5d5   : > { %s3450_s23 = scalar_lea.sflag [#allocation4], %s3449_s6 }
 0x5d6   : > { %p3706_p2 = pnand %p3709_p1, %p3950_p6 }
 0x5d8   : > { %3807 = dma.done.wait (!%p3706_p2), %s3450_s23, 512  }
 0x5d9   : > { %3809 = vsyncadd (!%p3706_p2), %s3450_s23, 4294966784  ;;  %p23_p3 = scmp.ge.s32.totalorder %s3933_s14, 4   ;;  %s4577_s25 = smov %s3816_s26 }
 0x5da   : > { %s4578_s26 = smov %s3820_s27  ;;  %s4579_s27 = smov %s3944_s17 }
 0x5db   : > { %s4580_s28 = smov %s3933_s14  ;;  %25 = sbr.rel (!%p23_p3) target bundleno = 7 (0x7), region = 131 }
 0x5e2   :  { %3455 = vsyncpa [#allocation4], 1 }
 0x5e3   :  { %3457 = vsyncpa [#allocation4 + $0x1], 1 }

</bundles_post_ra>
